<compile_context>
chip_gen: v6e
topology: v6e:2x2x1
jax: 0.10.0
libtpu: 0.0.40
codegen_flags: <defaults>
</compile_context>

<pallas_src>
import math
import functools

import jax
import jax.numpy as jnp
from jax.experimental import pallas as pl
from jax.experimental.pallas import tpu as pltpu


def _eqv_self_attention_kernel(
    kg_w1_ref, kg_b1_ref, kg_w2_ref, kg_b2_ref,     # SMEM: flattened k_g scalars (f32)
    y_ref, xp_ref,                                   # VMEM: (Bt,N,D) bf16, (Bt,3,N,N) bf16
    wqkv_ref, bqkv_ref, wo_ref, bo_ref,              # VMEM: (D,3D) bf16, (1,3D) f32, (D,D) bf16, (1,D) f32
    out_ref,                                         # VMEM: (Bt,N,D) f32
    *, num_heads):
  f32, bf16 = jnp.float32, jnp.bfloat16
  Bt, N, D = y_ref.shape
  H = num_heads
  ds = D // H
  scale = 1.0 / math.sqrt(D)

  # Fused QKV projection over all Bt*N rows: one bf16 MXU matmul, f32 accumulate.
  yflat = y_ref[...].reshape(Bt * N, D)
  qkv = jnp.dot(yflat, wqkv_ref[...], preferred_element_type=f32) + bqkv_ref[...]

  o1_rows = []
  for b in range(Bt):                                # static, small
    qkv_b = qkv[b * N:(b + 1) * N]                   # (N, 3D) f32, static slice
    xp0 = xp_ref[b, 0].astype(f32)                   # relative-pose channel planes
    xp1 = xp_ref[b, 1].astype(f32)
    xp2 = xp_ref[b, 2].astype(f32)

    head_outs = []
    for h in range(H):                               # static, small
      q_h = qkv_b[:, h * ds:(h + 1) * ds].astype(bf16)
      k_h = qkv_b[:, D + h * ds:D + (h + 1) * ds].astype(bf16)
      v_h = qkv_b[:, 2 * D + h * ds:2 * D + (h + 1) * ds]     # keep f32 (residual)

      # Content logits: (N, ds) x (N, ds)^T on the MXU (per-head lane slices,
      # no (H, N, ds) stack relayout).
      logits = jax.lax.dot_general(
          q_h, k_h, dimension_numbers=(((1,), (1,)), ((), ())),
          preferred_element_type=f32) * scale

      # Location logits: per-head MLP Linear(3,3) -> ReLU -> Linear(3,1) on the
      # VPU, accumulated straight onto the content logits (no loc buffer).
      logits = logits + kg_b2_ref[h]
      for j in range(3):
        hid = (xp0 * kg_w1_ref[h * 9 + 0 * 3 + j]
               + xp1 * kg_w1_ref[h * 9 + 1 * 3 + j]
               + xp2 * kg_w1_ref[h * 9 + 2 * 3 + j]
               + kg_b1_ref[h * 3 + j])
        logits = logits + jnp.maximum(hid, 0.0) * kg_w2_ref[h * 3 + j]

      m = jnp.max(logits, axis=-1, keepdims=True)
      p = jnp.exp(logits - m)
      denom = jnp.sum(p, axis=-1, keepdims=True)
      a = p * pl.reciprocal(denom, approx=True)      # softmax over keys

      av = jnp.dot(a.astype(bf16), v_h.astype(bf16),
                   preferred_element_type=f32)       # (N, ds) f32
      head_outs.append(v_h + av)                     # values residual

    o1_rows.append(jnp.concatenate(head_outs, axis=-1))   # (N, D) f32, in vregs

  o1 = jnp.concatenate(o1_rows, axis=0)              # (Bt*N, D) f32
  o2 = jnp.dot(o1.astype(bf16), wo_ref[...],
               preferred_element_type=f32) + bo_ref[...]
  out_ref[...] = (o1 + jnp.maximum(o2, 0.0)).reshape(Bt, N, D)   # O + relu(fc_o(O))


def _padded_block_bytes(shape, dtype):
  """VMEM bytes of one pipeline buffer (last two dims padded to tile size)."""
  itemsize = jnp.dtype(dtype).itemsize
  sublane = {4: 8, 2: 16, 1: 32}.get(itemsize, 8)
  shape = (1, 1) + tuple(int(d) for d in shape)
  lead = 1
  for d in shape[:-2]:
    lead *= d
  rows = -(-shape[-2] // sublane) * sublane
  cols = -(-shape[-1] // 128) * 128
  return lead * rows * cols * itemsize


def _pick_block_b(B, N):
  """Largest Bt dividing B with Bt*N <= 128 rows, keeping >= 2 grid steps (v7x 2 TCs)."""
  best = 1
  for bt in range(1, B + 1):
    if B % bt:
      continue
    if B >= 2 and (B // bt) < 2:
      continue
    if bt * N <= 128:
      best = bt
  return best


def _vmem_cap_bytes():
  try:
    return int(pltpu.get_tpu_info().vmem_capacity_bytes) * 7 // 8
  except Exception:
    return 48 << 20   # conservative: below v7x's 64 MiB physical


@functools.partial(jax.jit, static_argnames=('num_heads',))
def eqv_self_attention(x_lift, y_lift, x_pairs, params, num_heads):
  del x_lift  # X_lift is not used by the reference forward pass
  B, N, D = y_lift.shape
  assert D % num_heads == 0
  Bt = _pick_block_b(B, N)

  # One fused transpose+cast pass: (B,N,N,3) f32 -> (B,3,N,N) bf16.
  xp_t = jnp.transpose(x_pairs, (0, 3, 1, 2)).astype(jnp.bfloat16)
  y_b = y_lift.astype(jnp.bfloat16)

  # Fused QKV operands.
  wqkv = jnp.concatenate([params['wq'], params['wk'], params['wv']],
                         axis=1).astype(jnp.bfloat16)           # (D, 3D)
  bqkv = jnp.concatenate([params['bq'], params['bk'], params['bv']], axis=1)  # (1, 3D)
  wo = params['wo'].astype(jnp.bfloat16)

  kg_w1f = params['kg_w1'].reshape(-1)                 # (H*3*3,)
  kg_b1f = params['kg_b1'].reshape(-1)                 # (H*3,)
  kg_w2f = params['kg_w2'].reshape(-1)                 # (H*3,)
  kg_b2f = params['kg_b2'].reshape(-1)                 # (H,)

  smem_spec = pl.BlockSpec(memory_space=pltpu.MemorySpace.SMEM)
  full2d = lambda shape: pl.BlockSpec(shape, lambda b: (0, 0))

  # Scoped-VMEM budget: double-buffered pipeline blocks + live f32 intermediates.
  pad = _padded_block_bytes
  blocks = 2 * (pad((Bt, N, D), jnp.bfloat16)          # y
                + pad((Bt, 3, N, N), jnp.bfloat16)     # x_pairs
                + pad((Bt, N, D), jnp.float32)         # out
                + pad((D, 3 * D), jnp.bfloat16)        # wqkv
                + pad((1, 3 * D), jnp.float32)         # bqkv
                + pad((D, D), jnp.bfloat16)            # wo
                + pad((1, D), jnp.float32))            # bo
  live = (pad((Bt * N, 3 * D), jnp.float32)            # fused qkv activations
          + 3 * pad((N, N), jnp.float32)               # xp channels in f32
          + 6 * pad((N, N), jnp.float32)               # per-head softmax temporaries
          + 3 * pad((Bt * N, D), jnp.float32))         # o1 / o2 / output slab
  need = 4 * (blocks + live) + (2 << 20)
  vmem_limit = int(min(max(need, 32 << 20), _vmem_cap_bytes()))

  kernel = functools.partial(_eqv_self_attention_kernel, num_heads=num_heads)

  return pl.pallas_call(
      kernel,
      out_shape=jax.ShapeDtypeStruct((B, N, D), jnp.float32),
      grid=(B // Bt,),
      in_specs=[
          smem_spec, smem_spec, smem_spec, smem_spec,
          pl.BlockSpec((Bt, N, D), lambda b: (b, 0, 0)),
          pl.BlockSpec((Bt, 3, N, N), lambda b: (b, 0, 0, 0)),
          full2d((D, 3 * D)), full2d((1, 3 * D)),
          full2d((D, D)), full2d((1, D)),
      ],
      out_specs=pl.BlockSpec((Bt, N, D), lambda b: (b, 0, 0)),
      compiler_params=pltpu.CompilerParams(
          dimension_semantics=("parallel",),
          vmem_limit_bytes=vmem_limit),
  )(kg_w1f, kg_b1f, kg_w2f, kg_b2f,
    y_b, xp_t, wqkv, bqkv, wo, params['bo'])


def make_params(key, dim_q, dim_k, dim_v, num_heads):
  """Deterministic torch.nn.Linear-style init. Weights stored transposed (in, out)."""
  ks = jax.random.split(key, 12)

  def lin(k, fan_in, shape):
    bound = 1.0 / math.sqrt(fan_in)
    return jax.random.uniform(k, shape, jnp.float32, -bound, bound)

  return {
      'wq': lin(ks[0], dim_q, (dim_q, dim_v)), 'bq': lin(ks[1], dim_q, (1, dim_v)),
      'wk': lin(ks[2], dim_k, (dim_k, dim_v)), 'bk': lin(ks[3], dim_k, (1, dim_v)),
      'wv': lin(ks[4], dim_k, (dim_k, dim_v)), 'bv': lin(ks[5], dim_k, (1, dim_v)),
      'wo': lin(ks[6], dim_v, (dim_v, dim_v)), 'bo': lin(ks[7], dim_v, (1, dim_v)),
      'kg_w1': lin(ks[8], 3, (num_heads, 3, 3)),   # (in=3, out=3), transposed
      'kg_b1': lin(ks[9], 3, (num_heads, 3)),
      'kg_w2': lin(ks[10], 3, (num_heads, 3)),     # (in=3, out=1) flattened
      'kg_b2': lin(ks[11], 3, (num_heads,)),
  }


def reference_forward(y_lift, x_pairs, params, num_heads):
  """Pure-JAX mirror of EqvSelfAttention.forward (softmax, presence=None, ln=False)."""
  hp = jax.lax.Precision.HIGHEST
  B, N, D = y_lift.shape
  q = jnp.einsum('bnd,de->bne', y_lift, params['wq'], precision=hp) + params['bq'][0]
  k = jnp.einsum('bnd,de->bne', y_lift, params['wk'], precision=hp) + params['bk'][0]
  v = jnp.einsum('bnd,de->bne', y_lift, params['wv'], precision=hp) + params['bv'][0]
  Q_ = jnp.concatenate(jnp.split(q, num_heads, axis=2), axis=0)
  K_ = jnp.concatenate(jnp.split(k, num_heads, axis=2), axis=0)
  V_ = jnp.concatenate(jnp.split(v, num_heads, axis=2), axis=0)
  content = jnp.einsum('bqd,bkd->bqk', Q_, K_, precision=hp) / math.sqrt(D)
  locs = []
  for h in range(num_heads):
    hid = jnp.maximum(
        jnp.einsum('bqkc,cj->bqkj', x_pairs, params['kg_w1'][h], precision=hp)
        + params['kg_b1'][h], 0.0)
    locs.append(jnp.einsum('bqkj,j->bqk', hid, params['kg_w2'][h], precision=hp)
                + params['kg_b2'][h])
  logits = content + jnp.concatenate(locs, axis=0)
  A = jax.nn.softmax(logits, axis=2)
  av = jnp.einsum('bqk,bkd->bqd', A, V_, precision=hp)
  o = v + jnp.concatenate(jnp.split(av, num_heads, axis=0), axis=2)
  o = o + jnp.maximum(
      jnp.einsum('bnd,de->bne', o, params['wo'], precision=hp) + params['bo'][0], 0.0)
  return o


if __name__ == "__main__":
  key = jax.random.PRNGKey(0)
  B, N = 2, 8
  dim_q = dim_k = dim_v = 32
  num_heads = 4

  k_param, k_x, k_y, k_p = jax.random.split(key, 4)
  params = make_params(k_param, dim_q, dim_k, dim_v, num_heads)
  x_lift = jax.random.normal(k_x, (B, N, dim_q), jnp.float32)   # unused by forward
  y_lift = jax.random.normal(k_y, (B, N, dim_k), jnp.float32)
  x_pairs = jax.random.normal(k_p, (B, N, N, 3), jnp.float32)

  out = eqv_self_attention(x_lift, y_lift, x_pairs, params, num_heads)
  out = jax.block_until_ready(out)

  ref = reference_forward(y_lift, x_pairs, params, num_heads)
  assert out.shape == (B, N, dim_v), out.shape
  assert bool(jnp.allclose(out, ref, rtol=2e-2, atol=2e-2)), (
      f"max abs diff = {float(jnp.max(jnp.abs(out - ref)))}")
  print("KERNEL_OK")
</pallas_src>

<mosaic_0001>
module attributes {stable_mosaic.version = 11 : i64} {
  func.func @_eqv_self_attention_kernel(%arg0: i32, %arg1: memref<36xf32, #tpu.memory_space<smem>>, %arg2: memref<12xf32, #tpu.memory_space<smem>>, %arg3: memref<12xf32, #tpu.memory_space<smem>>, %arg4: memref<4xf32, #tpu.memory_space<smem>>, %arg5: memref<1x8x32xbf16, #tpu.memory_space<vmem>>, %arg6: memref<1x3x8x8xbf16, #tpu.memory_space<vmem>>, %arg7: memref<32x96xbf16, #tpu.memory_space<vmem>>, %arg8: memref<1x96xf32, #tpu.memory_space<vmem>>, %arg9: memref<32x32xbf16, #tpu.memory_space<vmem>>, %arg10: memref<1x32xf32, #tpu.memory_space<vmem>>, %arg11: memref<1x8x32xf32, #tpu.memory_space<vmem>>) attributes {dimension_semantics = [#tpu.dimension_semantics<parallel>], iteration_bounds = array<i64: 2>, scalar_prefetch = 0 : i64, scratch_operands = 0 : i64, tpu.core_type = #tpu.core_type<tc>, window_params = [{transform_indices = @transform_0, window_bounds = array<i64: 36>}, {transform_indices = @transform_1, window_bounds = array<i64: 12>}, {transform_indices = @transform_2, window_bounds = array<i64: 12>}, {transform_indices = @transform_3, window_bounds = array<i64: 4>}, {transform_indices = @transform_4, window_bounds = array<i64: 1, 8, 32>}, {transform_indices = @transform_5, window_bounds = array<i64: 1, 3, 8, 8>}, {pipeline_mode = #tpu.pipeline_mode<synchronous>, transform_indices = @transform_6, window_bounds = array<i64: 32, 96>}, {pipeline_mode = #tpu.pipeline_mode<synchronous>, transform_indices = @transform_7, window_bounds = array<i64: 1, 96>}, {pipeline_mode = #tpu.pipeline_mode<synchronous>, transform_indices = @transform_8, window_bounds = array<i64: 32, 32>}, {pipeline_mode = #tpu.pipeline_mode<synchronous>, transform_indices = @transform_9, window_bounds = array<i64: 1, 32>}, {transform_indices = @transform_10, window_bounds = array<i64: 1, 8, 32>}]} {
    %c0 = arith.constant 0 : index
    %c0_0 = arith.constant 0 : index
    %c0_1 = arith.constant 0 : index
    %0 = vector.load %arg5[%c0, %c0_0, %c0_1] : memref<1x8x32xbf16, #tpu.memory_space<vmem>>, vector<1x8x32xbf16>
    %1 = vector.shape_cast %0 : vector<1x8x32xbf16> to vector<8x32xbf16>
    %c0_2 = arith.constant 0 : index
    %c0_3 = arith.constant 0 : index
    %2 = vector.load %arg7[%c0_2, %c0_3] : memref<32x96xbf16, #tpu.memory_space<vmem>>, vector<32x96xbf16>
    %cst = arith.constant dense<0.000000e+00> : vector<8x96xf32>
    %3 = tpu.matmul %1, %2, %cst {dimension_numbers = #tpu.dot_dimension_numbers<[1], [0], [0], [1], [0, 0, 1, 1], [], []>} : vector<8x32xbf16>, vector<32x96xbf16>, vector<8x96xf32> -> vector<8x96xf32>
    %c0_4 = arith.constant 0 : index
    %c0_5 = arith.constant 0 : index
    %4 = vector.load %arg8[%c0_4, %c0_5] : memref<1x96xf32, #tpu.memory_space<vmem>>, vector<1x96xf32>
    %5 = vector.broadcast %4 : vector<1x96xf32> to vector<8x96xf32>
    %6 = arith.addf %3, %5 : vector<8x96xf32>
    %c0_6 = arith.constant 0 : index
    %c0_7 = arith.constant 0 : index
    %c0_8 = arith.constant 0 : index
    %c0_9 = arith.constant 0 : index
    %7 = vector.load %arg6[%c0_6, %c0_7, %c0_8, %c0_9] : memref<1x3x8x8xbf16, #tpu.memory_space<vmem>>, vector<1x1x8x8xbf16>
    %8 = vector.shape_cast %7 : vector<1x1x8x8xbf16> to vector<8x8xbf16>
    %9 = arith.extf %8 : vector<8x8xbf16> to vector<8x8xf32>
    %c0_10 = arith.constant 0 : index
    %c1 = arith.constant 1 : index
    %c0_11 = arith.constant 0 : index
    %c0_12 = arith.constant 0 : index
    %10 = vector.load %arg6[%c0_10, %c1, %c0_11, %c0_12] : memref<1x3x8x8xbf16, #tpu.memory_space<vmem>>, vector<1x1x8x8xbf16>
    %11 = vector.shape_cast %10 : vector<1x1x8x8xbf16> to vector<8x8xbf16>
    %12 = arith.extf %11 : vector<8x8xbf16> to vector<8x8xf32>
    %c0_13 = arith.constant 0 : index
    %c2 = arith.constant 2 : index
    %c0_14 = arith.constant 0 : index
    %c0_15 = arith.constant 0 : index
    %13 = vector.load %arg6[%c0_13, %c2, %c0_14, %c0_15] : memref<1x3x8x8xbf16, #tpu.memory_space<vmem>>, vector<1x1x8x8xbf16>
    %14 = vector.shape_cast %13 : vector<1x1x8x8xbf16> to vector<8x8xbf16>
    %15 = arith.extf %14 : vector<8x8xbf16> to vector<8x8xf32>
    %16 = vector.extract_strided_slice %6 {offsets = [0, 0], sizes = [8, 8], strides = [1, 1]} : vector<8x96xf32> to vector<8x8xf32>
    %17 = arith.truncf %16 : vector<8x8xf32> to vector<8x8xbf16>
    %18 = vector.extract_strided_slice %6 {offsets = [0, 32], sizes = [8, 8], strides = [1, 1]} : vector<8x96xf32> to vector<8x8xf32>
    %19 = arith.truncf %18 : vector<8x8xf32> to vector<8x8xbf16>
    %20 = vector.extract_strided_slice %6 {offsets = [0, 64], sizes = [8, 8], strides = [1, 1]} : vector<8x96xf32> to vector<8x8xf32>
    %cst_16 = arith.constant dense<0.000000e+00> : vector<8x8xf32>
    %21 = tpu.matmul %17, %19, %cst_16 {dimension_numbers = #tpu.dot_dimension_numbers<[1], [1], [0], [0], [0, 0, 1, 0], [], []>} : vector<8x8xbf16>, vector<8x8xbf16>, vector<8x8xf32> -> vector<8x8xf32>
    %cst_17 = arith.constant 0.176776692 : f32
    %22 = vector.broadcast %cst_17 : f32 to vector<8x8xf32>
    %23 = arith.mulf %21, %22 : vector<8x8xf32>
    %c0_18 = arith.constant 0 : index
    %24 = memref.load %arg4[%c0_18] : memref<4xf32, #tpu.memory_space<smem>>
    %25 = vector.broadcast %24 : f32 to vector<8x8xf32>
    %26 = arith.addf %23, %25 : vector<8x8xf32>
    %c0_19 = arith.constant 0 : index
    %27 = memref.load %arg1[%c0_19] : memref<36xf32, #tpu.memory_space<smem>>
    %28 = vector.broadcast %27 : f32 to vector<8x8xf32>
    %29 = arith.mulf %9, %28 : vector<8x8xf32>
    %c3 = arith.constant 3 : index
    %30 = memref.load %arg1[%c3] : memref<36xf32, #tpu.memory_space<smem>>
    %31 = vector.broadcast %30 : f32 to vector<8x8xf32>
    %32 = arith.mulf %12, %31 : vector<8x8xf32>
    %33 = arith.addf %29, %32 : vector<8x8xf32>
    %c6 = arith.constant 6 : index
    %34 = memref.load %arg1[%c6] : memref<36xf32, #tpu.memory_space<smem>>
    %35 = vector.broadcast %34 : f32 to vector<8x8xf32>
    %36 = arith.mulf %15, %35 : vector<8x8xf32>
    %37 = arith.addf %33, %36 : vector<8x8xf32>
    %c0_20 = arith.constant 0 : index
    %38 = memref.load %arg2[%c0_20] : memref<12xf32, #tpu.memory_space<smem>>
    %39 = vector.broadcast %38 : f32 to vector<8x8xf32>
    %40 = arith.addf %37, %39 : vector<8x8xf32>
    %cst_21 = arith.constant 0.000000e+00 : f32
    %41 = vector.broadcast %cst_21 : f32 to vector<8x8xf32>
    %42 = arith.maximumf %40, %41 : vector<8x8xf32>
    %c0_22 = arith.constant 0 : index
    %43 = memref.load %arg3[%c0_22] : memref<12xf32, #tpu.memory_space<smem>>
    %44 = vector.broadcast %43 : f32 to vector<8x8xf32>
    %45 = arith.mulf %42, %44 : vector<8x8xf32>
    %46 = arith.addf %26, %45 : vector<8x8xf32>
    %c1_23 = arith.constant 1 : index
    %47 = memref.load %arg1[%c1_23] : memref<36xf32, #tpu.memory_space<smem>>
    %48 = vector.broadcast %47 : f32 to vector<8x8xf32>
    %49 = arith.mulf %9, %48 : vector<8x8xf32>
    %c4 = arith.constant 4 : index
    %50 = memref.load %arg1[%c4] : memref<36xf32, #tpu.memory_space<smem>>
    %51 = vector.broadcast %50 : f32 to vector<8x8xf32>
    %52 = arith.mulf %12, %51 : vector<8x8xf32>
    %53 = arith.addf %49, %52 : vector<8x8xf32>
    %c7 = arith.constant 7 : index
    %54 = memref.load %arg1[%c7] : memref<36xf32, #tpu.memory_space<smem>>
    %55 = vector.broadcast %54 : f32 to vector<8x8xf32>
    %56 = arith.mulf %15, %55 : vector<8x8xf32>
    %57 = arith.addf %53, %56 : vector<8x8xf32>
    %c1_24 = arith.constant 1 : index
    %58 = memref.load %arg2[%c1_24] : memref<12xf32, #tpu.memory_space<smem>>
    %59 = vector.broadcast %58 : f32 to vector<8x8xf32>
    %60 = arith.addf %57, %59 : vector<8x8xf32>
    %cst_25 = arith.constant 0.000000e+00 : f32
    %61 = vector.broadcast %cst_25 : f32 to vector<8x8xf32>
    %62 = arith.maximumf %60, %61 : vector<8x8xf32>
    %c1_26 = arith.constant 1 : index
    %63 = memref.load %arg3[%c1_26] : memref<12xf32, #tpu.memory_space<smem>>
    %64 = vector.broadcast %63 : f32 to vector<8x8xf32>
    %65 = arith.mulf %62, %64 : vector<8x8xf32>
    %66 = arith.addf %46, %65 : vector<8x8xf32>
    %c2_27 = arith.constant 2 : index
    %67 = memref.load %arg1[%c2_27] : memref<36xf32, #tpu.memory_space<smem>>
    %68 = vector.broadcast %67 : f32 to vector<8x8xf32>
    %69 = arith.mulf %9, %68 : vector<8x8xf32>
    %c5 = arith.constant 5 : index
    %70 = memref.load %arg1[%c5] : memref<36xf32, #tpu.memory_space<smem>>
    %71 = vector.broadcast %70 : f32 to vector<8x8xf32>
    %72 = arith.mulf %12, %71 : vector<8x8xf32>
    %73 = arith.addf %69, %72 : vector<8x8xf32>
    %c8 = arith.constant 8 : index
    %74 = memref.load %arg1[%c8] : memref<36xf32, #tpu.memory_space<smem>>
    %75 = vector.broadcast %74 : f32 to vector<8x8xf32>
    %76 = arith.mulf %15, %75 : vector<8x8xf32>
    %77 = arith.addf %73, %76 : vector<8x8xf32>
    %c2_28 = arith.constant 2 : index
    %78 = memref.load %arg2[%c2_28] : memref<12xf32, #tpu.memory_space<smem>>
    %79 = vector.broadcast %78 : f32 to vector<8x8xf32>
    %80 = arith.addf %77, %79 : vector<8x8xf32>
    %cst_29 = arith.constant 0.000000e+00 : f32
    %81 = vector.broadcast %cst_29 : f32 to vector<8x8xf32>
    %82 = arith.maximumf %80, %81 : vector<8x8xf32>
    %c2_30 = arith.constant 2 : index
    %83 = memref.load %arg3[%c2_30] : memref<12xf32, #tpu.memory_space<smem>>
    %84 = vector.broadcast %83 : f32 to vector<8x8xf32>
    %85 = arith.mulf %82, %84 : vector<8x8xf32>
    %86 = arith.addf %66, %85 : vector<8x8xf32>
    %cst_31 = arith.constant dense<0xFF800000> : vector<8xf32>
    %87 = vector.multi_reduction <maximumf>, %86, %cst_31 [1] : vector<8x8xf32> to vector<8xf32>
    %88 = vector.shape_cast %87 : vector<8xf32> to vector<8x1xf32>
    %89 = vector.broadcast %88 : vector<8x1xf32> to vector<8x8xf32>
    %90 = arith.subf %86, %89 : vector<8x8xf32>
    %91 = math.exp %90 : vector<8x8xf32>
    %cst_32 = arith.constant dense<0.000000e+00> : vector<8xf32>
    %92 = vector.multi_reduction <add>, %91, %cst_32 [1] : vector<8x8xf32> to vector<8xf32>
    %93 = vector.shape_cast %92 : vector<8xf32> to vector<8x1xf32>
    %94 = tpu.reciprocal %93 {approx = true} : vector<8x1xf32> -> vector<8x1xf32>
    %95 = vector.broadcast %94 : vector<8x1xf32> to vector<8x8xf32>
    %96 = arith.mulf %91, %95 : vector<8x8xf32>
    %97 = arith.truncf %96 : vector<8x8xf32> to vector<8x8xbf16>
    %98 = arith.truncf %20 : vector<8x8xf32> to vector<8x8xbf16>
    %cst_33 = arith.constant dense<0.000000e+00> : vector<8x8xf32>
    %99 = tpu.matmul %97, %98, %cst_33 {dimension_numbers = #tpu.dot_dimension_numbers<[1], [0], [0], [1], [0, 0, 1, 1], [], []>} : vector<8x8xbf16>, vector<8x8xbf16>, vector<8x8xf32> -> vector<8x8xf32>
    %100 = arith.addf %20, %99 : vector<8x8xf32>
    %101 = vector.extract_strided_slice %6 {offsets = [0, 8], sizes = [8, 8], strides = [1, 1]} : vector<8x96xf32> to vector<8x8xf32>
    %102 = arith.truncf %101 : vector<8x8xf32> to vector<8x8xbf16>
    %103 = vector.extract_strided_slice %6 {offsets = [0, 40], sizes = [8, 8], strides = [1, 1]} : vector<8x96xf32> to vector<8x8xf32>
    %104 = arith.truncf %103 : vector<8x8xf32> to vector<8x8xbf16>
    %105 = vector.extract_strided_slice %6 {offsets = [0, 72], sizes = [8, 8], strides = [1, 1]} : vector<8x96xf32> to vector<8x8xf32>
    %cst_34 = arith.constant dense<0.000000e+00> : vector<8x8xf32>
    %106 = tpu.matmul %102, %104, %cst_34 {dimension_numbers = #tpu.dot_dimension_numbers<[1], [1], [0], [0], [0, 0, 1, 0], [], []>} : vector<8x8xbf16>, vector<8x8xbf16>, vector<8x8xf32> -> vector<8x8xf32>
    %cst_35 = arith.constant 0.176776692 : f32
    %107 = vector.broadcast %cst_35 : f32 to vector<8x8xf32>
    %108 = arith.mulf %106, %107 : vector<8x8xf32>
    %c1_36 = arith.constant 1 : index
    %109 = memref.load %arg4[%c1_36] : memref<4xf32, #tpu.memory_space<smem>>
    %110 = vector.broadcast %109 : f32 to vector<8x8xf32>
    %111 = arith.addf %108, %110 : vector<8x8xf32>
    %c9 = arith.constant 9 : index
    %112 = memref.load %arg1[%c9] : memref<36xf32, #tpu.memory_space<smem>>
    %113 = vector.broadcast %112 : f32 to vector<8x8xf32>
    %114 = arith.mulf %9, %113 : vector<8x8xf32>
    %c12 = arith.constant 12 : index
    %115 = memref.load %arg1[%c12] : memref<36xf32, #tpu.memory_space<smem>>
    %116 = vector.broadcast %115 : f32 to vector<8x8xf32>
    %117 = arith.mulf %12, %116 : vector<8x8xf32>
    %118 = arith.addf %114, %117 : vector<8x8xf32>
    %c15 = arith.constant 15 : index
    %119 = memref.load %arg1[%c15] : memref<36xf32, #tpu.memory_space<smem>>
    %120 = vector.broadcast %119 : f32 to vector<8x8xf32>
    %121 = arith.mulf %15, %120 : vector<8x8xf32>
    %122 = arith.addf %118, %121 : vector<8x8xf32>
    %c3_37 = arith.constant 3 : index
    %123 = memref.load %arg2[%c3_37] : memref<12xf32, #tpu.memory_space<smem>>
    %124 = vector.broadcast %123 : f32 to vector<8x8xf32>
    %125 = arith.addf %122, %124 : vector<8x8xf32>
    %cst_38 = arith.constant 0.000000e+00 : f32
    %126 = vector.broadcast %cst_38 : f32 to vector<8x8xf32>
    %127 = arith.maximumf %125, %126 : vector<8x8xf32>
    %c3_39 = arith.constant 3 : index
    %128 = memref.load %arg3[%c3_39] : memref<12xf32, #tpu.memory_space<smem>>
    %129 = vector.broadcast %128 : f32 to vector<8x8xf32>
    %130 = arith.mulf %127, %129 : vector<8x8xf32>
    %131 = arith.addf %111, %130 : vector<8x8xf32>
    %c10 = arith.constant 10 : index
    %132 = memref.load %arg1[%c10] : memref<36xf32, #tpu.memory_space<smem>>
    %133 = vector.broadcast %132 : f32 to vector<8x8xf32>
    %134 = arith.mulf %9, %133 : vector<8x8xf32>
    %c13 = arith.constant 13 : index
    %135 = memref.load %arg1[%c13] : memref<36xf32, #tpu.memory_space<smem>>
    %136 = vector.broadcast %135 : f32 to vector<8x8xf32>
    %137 = arith.mulf %12, %136 : vector<8x8xf32>
    %138 = arith.addf %134, %137 : vector<8x8xf32>
    %c16 = arith.constant 16 : index
    %139 = memref.load %arg1[%c16] : memref<36xf32, #tpu.memory_space<smem>>
    %140 = vector.broadcast %139 : f32 to vector<8x8xf32>
    %141 = arith.mulf %15, %140 : vector<8x8xf32>
    %142 = arith.addf %138, %141 : vector<8x8xf32>
    %c4_40 = arith.constant 4 : index
    %143 = memref.load %arg2[%c4_40] : memref<12xf32, #tpu.memory_space<smem>>
    %144 = vector.broadcast %143 : f32 to vector<8x8xf32>
    %145 = arith.addf %142, %144 : vector<8x8xf32>
    %cst_41 = arith.constant 0.000000e+00 : f32
    %146 = vector.broadcast %cst_41 : f32 to vector<8x8xf32>
    %147 = arith.maximumf %145, %146 : vector<8x8xf32>
    %c4_42 = arith.constant 4 : index
    %148 = memref.load %arg3[%c4_42] : memref<12xf32, #tpu.memory_space<smem>>
    %149 = vector.broadcast %148 : f32 to vector<8x8xf32>
    %150 = arith.mulf %147, %149 : vector<8x8xf32>
    %151 = arith.addf %131, %150 : vector<8x8xf32>
    %c11 = arith.constant 11 : index
    %152 = memref.load %arg1[%c11] : memref<36xf32, #tpu.memory_space<smem>>
    %153 = vector.broadcast %152 : f32 to vector<8x8xf32>
    %154 = arith.mulf %9, %153 : vector<8x8xf32>
    %c14 = arith.constant 14 : index
    %155 = memref.load %arg1[%c14] : memref<36xf32, #tpu.memory_space<smem>>
    %156 = vector.broadcast %155 : f32 to vector<8x8xf32>
    %157 = arith.mulf %12, %156 : vector<8x8xf32>
    %158 = arith.addf %154, %157 : vector<8x8xf32>
    %c17 = arith.constant 17 : index
    %159 = memref.load %arg1[%c17] : memref<36xf32, #tpu.memory_space<smem>>
    %160 = vector.broadcast %159 : f32 to vector<8x8xf32>
    %161 = arith.mulf %15, %160 : vector<8x8xf32>
    %162 = arith.addf %158, %161 : vector<8x8xf32>
    %c5_43 = arith.constant 5 : index
    %163 = memref.load %arg2[%c5_43] : memref<12xf32, #tpu.memory_space<smem>>
    %164 = vector.broadcast %163 : f32 to vector<8x8xf32>
    %165 = arith.addf %162, %164 : vector<8x8xf32>
    %cst_44 = arith.constant 0.000000e+00 : f32
    %166 = vector.broadcast %cst_44 : f32 to vector<8x8xf32>
    %167 = arith.maximumf %165, %166 : vector<8x8xf32>
    %c5_45 = arith.constant 5 : index
    %168 = memref.load %arg3[%c5_45] : memref<12xf32, #tpu.memory_space<smem>>
    %169 = vector.broadcast %168 : f32 to vector<8x8xf32>
    %170 = arith.mulf %167, %169 : vector<8x8xf32>
    %171 = arith.addf %151, %170 : vector<8x8xf32>
    %cst_46 = arith.constant dense<0xFF800000> : vector<8xf32>
    %172 = vector.multi_reduction <maximumf>, %171, %cst_46 [1] : vector<8x8xf32> to vector<8xf32>
    %173 = vector.shape_cast %172 : vector<8xf32> to vector<8x1xf32>
    %174 = vector.broadcast %173 : vector<8x1xf32> to vector<8x8xf32>
    %175 = arith.subf %171, %174 : vector<8x8xf32>
    %176 = math.exp %175 : vector<8x8xf32>
    %cst_47 = arith.constant dense<0.000000e+00> : vector<8xf32>
    %177 = vector.multi_reduction <add>, %176, %cst_47 [1] : vector<8x8xf32> to vector<8xf32>
    %178 = vector.shape_cast %177 : vector<8xf32> to vector<8x1xf32>
    %179 = tpu.reciprocal %178 {approx = true} : vector<8x1xf32> -> vector<8x1xf32>
    %180 = vector.broadcast %179 : vector<8x1xf32> to vector<8x8xf32>
    %181 = arith.mulf %176, %180 : vector<8x8xf32>
    %182 = arith.truncf %181 : vector<8x8xf32> to vector<8x8xbf16>
    %183 = arith.truncf %105 : vector<8x8xf32> to vector<8x8xbf16>
    %cst_48 = arith.constant dense<0.000000e+00> : vector<8x8xf32>
    %184 = tpu.matmul %182, %183, %cst_48 {dimension_numbers = #tpu.dot_dimension_numbers<[1], [0], [0], [1], [0, 0, 1, 1], [], []>} : vector<8x8xbf16>, vector<8x8xbf16>, vector<8x8xf32> -> vector<8x8xf32>
    %185 = arith.addf %105, %184 : vector<8x8xf32>
    %186 = vector.extract_strided_slice %6 {offsets = [0, 16], sizes = [8, 8], strides = [1, 1]} : vector<8x96xf32> to vector<8x8xf32>
    %187 = arith.truncf %186 : vector<8x8xf32> to vector<8x8xbf16>
    %188 = vector.extract_strided_slice %6 {offsets = [0, 48], sizes = [8, 8], strides = [1, 1]} : vector<8x96xf32> to vector<8x8xf32>
    %189 = arith.truncf %188 : vector<8x8xf32> to vector<8x8xbf16>
    %190 = vector.extract_strided_slice %6 {offsets = [0, 80], sizes = [8, 8], strides = [1, 1]} : vector<8x96xf32> to vector<8x8xf32>
    %cst_49 = arith.constant dense<0.000000e+00> : vector<8x8xf32>
    %191 = tpu.matmul %187, %189, %cst_49 {dimension_numbers = #tpu.dot_dimension_numbers<[1], [1], [0], [0], [0, 0, 1, 0], [], []>} : vector<8x8xbf16>, vector<8x8xbf16>, vector<8x8xf32> -> vector<8x8xf32>
    %cst_50 = arith.constant 0.176776692 : f32
    %192 = vector.broadcast %cst_50 : f32 to vector<8x8xf32>
    %193 = arith.mulf %191, %192 : vector<8x8xf32>
    %c2_51 = arith.constant 2 : index
    %194 = memref.load %arg4[%c2_51] : memref<4xf32, #tpu.memory_space<smem>>
    %195 = vector.broadcast %194 : f32 to vector<8x8xf32>
    %196 = arith.addf %193, %195 : vector<8x8xf32>
    %c18 = arith.constant 18 : index
    %197 = memref.load %arg1[%c18] : memref<36xf32, #tpu.memory_space<smem>>
    %198 = vector.broadcast %197 : f32 to vector<8x8xf32>
    %199 = arith.mulf %9, %198 : vector<8x8xf32>
    %c21 = arith.constant 21 : index
    %200 = memref.load %arg1[%c21] : memref<36xf32, #tpu.memory_space<smem>>
    %201 = vector.broadcast %200 : f32 to vector<8x8xf32>
    %202 = arith.mulf %12, %201 : vector<8x8xf32>
    %203 = arith.addf %199, %202 : vector<8x8xf32>
    %c24 = arith.constant 24 : index
    %204 = memref.load %arg1[%c24] : memref<36xf32, #tpu.memory_space<smem>>
    %205 = vector.broadcast %204 : f32 to vector<8x8xf32>
    %206 = arith.mulf %15, %205 : vector<8x8xf32>
    %207 = arith.addf %203, %206 : vector<8x8xf32>
    %c6_52 = arith.constant 6 : index
    %208 = memref.load %arg2[%c6_52] : memref<12xf32, #tpu.memory_space<smem>>
    %209 = vector.broadcast %208 : f32 to vector<8x8xf32>
    %210 = arith.addf %207, %209 : vector<8x8xf32>
    %cst_53 = arith.constant 0.000000e+00 : f32
    %211 = vector.broadcast %cst_53 : f32 to vector<8x8xf32>
    %212 = arith.maximumf %210, %211 : vector<8x8xf32>
    %c6_54 = arith.constant 6 : index
    %213 = memref.load %arg3[%c6_54] : memref<12xf32, #tpu.memory_space<smem>>
    %214 = vector.broadcast %213 : f32 to vector<8x8xf32>
    %215 = arith.mulf %212, %214 : vector<8x8xf32>
    %216 = arith.addf %196, %215 : vector<8x8xf32>
    %c19 = arith.constant 19 : index
    %217 = memref.load %arg1[%c19] : memref<36xf32, #tpu.memory_space<smem>>
    %218 = vector.broadcast %217 : f32 to vector<8x8xf32>
    %219 = arith.mulf %9, %218 : vector<8x8xf32>
    %c22 = arith.constant 22 : index
    %220 = memref.load %arg1[%c22] : memref<36xf32, #tpu.memory_space<smem>>
    %221 = vector.broadcast %220 : f32 to vector<8x8xf32>
    %222 = arith.mulf %12, %221 : vector<8x8xf32>
    %223 = arith.addf %219, %222 : vector<8x8xf32>
    %c25 = arith.constant 25 : index
    %224 = memref.load %arg1[%c25] : memref<36xf32, #tpu.memory_space<smem>>
    %225 = vector.broadcast %224 : f32 to vector<8x8xf32>
    %226 = arith.mulf %15, %225 : vector<8x8xf32>
    %227 = arith.addf %223, %226 : vector<8x8xf32>
    %c7_55 = arith.constant 7 : index
    %228 = memref.load %arg2[%c7_55] : memref<12xf32, #tpu.memory_space<smem>>
    %229 = vector.broadcast %228 : f32 to vector<8x8xf32>
    %230 = arith.addf %227, %229 : vector<8x8xf32>
    %cst_56 = arith.constant 0.000000e+00 : f32
    %231 = vector.broadcast %cst_56 : f32 to vector<8x8xf32>
    %232 = arith.maximumf %230, %231 : vector<8x8xf32>
    %c7_57 = arith.constant 7 : index
    %233 = memref.load %arg3[%c7_57] : memref<12xf32, #tpu.memory_space<smem>>
    %234 = vector.broadcast %233 : f32 to vector<8x8xf32>
    %235 = arith.mulf %232, %234 : vector<8x8xf32>
    %236 = arith.addf %216, %235 : vector<8x8xf32>
    %c20 = arith.constant 20 : index
    %237 = memref.load %arg1[%c20] : memref<36xf32, #tpu.memory_space<smem>>
    %238 = vector.broadcast %237 : f32 to vector<8x8xf32>
    %239 = arith.mulf %9, %238 : vector<8x8xf32>
    %c23 = arith.constant 23 : index
    %240 = memref.load %arg1[%c23] : memref<36xf32, #tpu.memory_space<smem>>
    %241 = vector.broadcast %240 : f32 to vector<8x8xf32>
    %242 = arith.mulf %12, %241 : vector<8x8xf32>
    %243 = arith.addf %239, %242 : vector<8x8xf32>
    %c26 = arith.constant 26 : index
    %244 = memref.load %arg1[%c26] : memref<36xf32, #tpu.memory_space<smem>>
    %245 = vector.broadcast %244 : f32 to vector<8x8xf32>
    %246 = arith.mulf %15, %245 : vector<8x8xf32>
    %247 = arith.addf %243, %246 : vector<8x8xf32>
    %c8_58 = arith.constant 8 : index
    %248 = memref.load %arg2[%c8_58] : memref<12xf32, #tpu.memory_space<smem>>
    %249 = vector.broadcast %248 : f32 to vector<8x8xf32>
    %250 = arith.addf %247, %249 : vector<8x8xf32>
    %cst_59 = arith.constant 0.000000e+00 : f32
    %251 = vector.broadcast %cst_59 : f32 to vector<8x8xf32>
    %252 = arith.maximumf %250, %251 : vector<8x8xf32>
    %c8_60 = arith.constant 8 : index
    %253 = memref.load %arg3[%c8_60] : memref<12xf32, #tpu.memory_space<smem>>
    %254 = vector.broadcast %253 : f32 to vector<8x8xf32>
    %255 = arith.mulf %252, %254 : vector<8x8xf32>
    %256 = arith.addf %236, %255 : vector<8x8xf32>
    %cst_61 = arith.constant dense<0xFF800000> : vector<8xf32>
    %257 = vector.multi_reduction <maximumf>, %256, %cst_61 [1] : vector<8x8xf32> to vector<8xf32>
    %258 = vector.shape_cast %257 : vector<8xf32> to vector<8x1xf32>
    %259 = vector.broadcast %258 : vector<8x1xf32> to vector<8x8xf32>
    %260 = arith.subf %256, %259 : vector<8x8xf32>
    %261 = math.exp %260 : vector<8x8xf32>
    %cst_62 = arith.constant dense<0.000000e+00> : vector<8xf32>
    %262 = vector.multi_reduction <add>, %261, %cst_62 [1] : vector<8x8xf32> to vector<8xf32>
    %263 = vector.shape_cast %262 : vector<8xf32> to vector<8x1xf32>
    %264 = tpu.reciprocal %263 {approx = true} : vector<8x1xf32> -> vector<8x1xf32>
    %265 = vector.broadcast %264 : vector<8x1xf32> to vector<8x8xf32>
    %266 = arith.mulf %261, %265 : vector<8x8xf32>
    %267 = arith.truncf %266 : vector<8x8xf32> to vector<8x8xbf16>
    %268 = arith.truncf %190 : vector<8x8xf32> to vector<8x8xbf16>
    %cst_63 = arith.constant dense<0.000000e+00> : vector<8x8xf32>
    %269 = tpu.matmul %267, %268, %cst_63 {dimension_numbers = #tpu.dot_dimension_numbers<[1], [0], [0], [1], [0, 0, 1, 1], [], []>} : vector<8x8xbf16>, vector<8x8xbf16>, vector<8x8xf32> -> vector<8x8xf32>
    %270 = arith.addf %190, %269 : vector<8x8xf32>
    %271 = vector.extract_strided_slice %6 {offsets = [0, 24], sizes = [8, 8], strides = [1, 1]} : vector<8x96xf32> to vector<8x8xf32>
    %272 = arith.truncf %271 : vector<8x8xf32> to vector<8x8xbf16>
    %273 = vector.extract_strided_slice %6 {offsets = [0, 56], sizes = [8, 8], strides = [1, 1]} : vector<8x96xf32> to vector<8x8xf32>
    %274 = arith.truncf %273 : vector<8x8xf32> to vector<8x8xbf16>
    %275 = vector.extract_strided_slice %6 {offsets = [0, 88], sizes = [8, 8], strides = [1, 1]} : vector<8x96xf32> to vector<8x8xf32>
    %cst_64 = arith.constant dense<0.000000e+00> : vector<8x8xf32>
    %276 = tpu.matmul %272, %274, %cst_64 {dimension_numbers = #tpu.dot_dimension_numbers<[1], [1], [0], [0], [0, 0, 1, 0], [], []>} : vector<8x8xbf16>, vector<8x8xbf16>, vector<8x8xf32> -> vector<8x8xf32>
    %cst_65 = arith.constant 0.176776692 : f32
    %277 = vector.broadcast %cst_65 : f32 to vector<8x8xf32>
    %278 = arith.mulf %276, %277 : vector<8x8xf32>
    %c3_66 = arith.constant 3 : index
    %279 = memref.load %arg4[%c3_66] : memref<4xf32, #tpu.memory_space<smem>>
    %280 = vector.broadcast %279 : f32 to vector<8x8xf32>
    %281 = arith.addf %278, %280 : vector<8x8xf32>
    %c27 = arith.constant 27 : index
    %282 = memref.load %arg1[%c27] : memref<36xf32, #tpu.memory_space<smem>>
    %283 = vector.broadcast %282 : f32 to vector<8x8xf32>
    %284 = arith.mulf %9, %283 : vector<8x8xf32>
    %c30 = arith.constant 30 : index
    %285 = memref.load %arg1[%c30] : memref<36xf32, #tpu.memory_space<smem>>
    %286 = vector.broadcast %285 : f32 to vector<8x8xf32>
    %287 = arith.mulf %12, %286 : vector<8x8xf32>
    %288 = arith.addf %284, %287 : vector<8x8xf32>
    %c33 = arith.constant 33 : index
    %289 = memref.load %arg1[%c33] : memref<36xf32, #tpu.memory_space<smem>>
    %290 = vector.broadcast %289 : f32 to vector<8x8xf32>
    %291 = arith.mulf %15, %290 : vector<8x8xf32>
    %292 = arith.addf %288, %291 : vector<8x8xf32>
    %c9_67 = arith.constant 9 : index
    %293 = memref.load %arg2[%c9_67] : memref<12xf32, #tpu.memory_space<smem>>
    %294 = vector.broadcast %293 : f32 to vector<8x8xf32>
    %295 = arith.addf %292, %294 : vector<8x8xf32>
    %cst_68 = arith.constant 0.000000e+00 : f32
    %296 = vector.broadcast %cst_68 : f32 to vector<8x8xf32>
    %297 = arith.maximumf %295, %296 : vector<8x8xf32>
    %c9_69 = arith.constant 9 : index
    %298 = memref.load %arg3[%c9_69] : memref<12xf32, #tpu.memory_space<smem>>
    %299 = vector.broadcast %298 : f32 to vector<8x8xf32>
    %300 = arith.mulf %297, %299 : vector<8x8xf32>
    %301 = arith.addf %281, %300 : vector<8x8xf32>
    %c28 = arith.constant 28 : index
    %302 = memref.load %arg1[%c28] : memref<36xf32, #tpu.memory_space<smem>>
    %303 = vector.broadcast %302 : f32 to vector<8x8xf32>
    %304 = arith.mulf %9, %303 : vector<8x8xf32>
    %c31 = arith.constant 31 : index
    %305 = memref.load %arg1[%c31] : memref<36xf32, #tpu.memory_space<smem>>
    %306 = vector.broadcast %305 : f32 to vector<8x8xf32>
    %307 = arith.mulf %12, %306 : vector<8x8xf32>
    %308 = arith.addf %304, %307 : vector<8x8xf32>
    %c34 = arith.constant 34 : index
    %309 = memref.load %arg1[%c34] : memref<36xf32, #tpu.memory_space<smem>>
    %310 = vector.broadcast %309 : f32 to vector<8x8xf32>
    %311 = arith.mulf %15, %310 : vector<8x8xf32>
    %312 = arith.addf %308, %311 : vector<8x8xf32>
    %c10_70 = arith.constant 10 : index
    %313 = memref.load %arg2[%c10_70] : memref<12xf32, #tpu.memory_space<smem>>
    %314 = vector.broadcast %313 : f32 to vector<8x8xf32>
    %315 = arith.addf %312, %314 : vector<8x8xf32>
    %cst_71 = arith.constant 0.000000e+00 : f32
    %316 = vector.broadcast %cst_71 : f32 to vector<8x8xf32>
    %317 = arith.maximumf %315, %316 : vector<8x8xf32>
    %c10_72 = arith.constant 10 : index
    %318 = memref.load %arg3[%c10_72] : memref<12xf32, #tpu.memory_space<smem>>
    %319 = vector.broadcast %318 : f32 to vector<8x8xf32>
    %320 = arith.mulf %317, %319 : vector<8x8xf32>
    %321 = arith.addf %301, %320 : vector<8x8xf32>
    %c29 = arith.constant 29 : index
    %322 = memref.load %arg1[%c29] : memref<36xf32, #tpu.memory_space<smem>>
    %323 = vector.broadcast %322 : f32 to vector<8x8xf32>
    %324 = arith.mulf %9, %323 : vector<8x8xf32>
    %c32 = arith.constant 32 : index
    %325 = memref.load %arg1[%c32] : memref<36xf32, #tpu.memory_space<smem>>
    %326 = vector.broadcast %325 : f32 to vector<8x8xf32>
    %327 = arith.mulf %12, %326 : vector<8x8xf32>
    %328 = arith.addf %324, %327 : vector<8x8xf32>
    %c35 = arith.constant 35 : index
    %329 = memref.load %arg1[%c35] : memref<36xf32, #tpu.memory_space<smem>>
    %330 = vector.broadcast %329 : f32 to vector<8x8xf32>
    %331 = arith.mulf %15, %330 : vector<8x8xf32>
    %332 = arith.addf %328, %331 : vector<8x8xf32>
    %c11_73 = arith.constant 11 : index
    %333 = memref.load %arg2[%c11_73] : memref<12xf32, #tpu.memory_space<smem>>
    %334 = vector.broadcast %333 : f32 to vector<8x8xf32>
    %335 = arith.addf %332, %334 : vector<8x8xf32>
    %cst_74 = arith.constant 0.000000e+00 : f32
    %336 = vector.broadcast %cst_74 : f32 to vector<8x8xf32>
    %337 = arith.maximumf %335, %336 : vector<8x8xf32>
    %c11_75 = arith.constant 11 : index
    %338 = memref.load %arg3[%c11_75] : memref<12xf32, #tpu.memory_space<smem>>
    %339 = vector.broadcast %338 : f32 to vector<8x8xf32>
    %340 = arith.mulf %337, %339 : vector<8x8xf32>
    %341 = arith.addf %321, %340 : vector<8x8xf32>
    %cst_76 = arith.constant dense<0xFF800000> : vector<8xf32>
    %342 = vector.multi_reduction <maximumf>, %341, %cst_76 [1] : vector<8x8xf32> to vector<8xf32>
    %343 = vector.shape_cast %342 : vector<8xf32> to vector<8x1xf32>
    %344 = vector.broadcast %343 : vector<8x1xf32> to vector<8x8xf32>
    %345 = arith.subf %341, %344 : vector<8x8xf32>
    %346 = math.exp %345 : vector<8x8xf32>
    %cst_77 = arith.constant dense<0.000000e+00> : vector<8xf32>
    %347 = vector.multi_reduction <add>, %346, %cst_77 [1] : vector<8x8xf32> to vector<8xf32>
    %348 = vector.shape_cast %347 : vector<8xf32> to vector<8x1xf32>
    %349 = tpu.reciprocal %348 {approx = true} : vector<8x1xf32> -> vector<8x1xf32>
    %350 = vector.broadcast %349 : vector<8x1xf32> to vector<8x8xf32>
    %351 = arith.mulf %346, %350 : vector<8x8xf32>
    %352 = arith.truncf %351 : vector<8x8xf32> to vector<8x8xbf16>
    %353 = arith.truncf %275 : vector<8x8xf32> to vector<8x8xbf16>
    %cst_78 = arith.constant dense<0.000000e+00> : vector<8x8xf32>
    %354 = tpu.matmul %352, %353, %cst_78 {dimension_numbers = #tpu.dot_dimension_numbers<[1], [0], [0], [1], [0, 0, 1, 1], [], []>} : vector<8x8xbf16>, vector<8x8xbf16>, vector<8x8xf32> -> vector<8x8xf32>
    %355 = arith.addf %275, %354 : vector<8x8xf32>
    %356 = tpu.concatenate %100, %185, %270, %355 in 1 : vector<8x8xf32>, vector<8x8xf32>, vector<8x8xf32>, vector<8x8xf32> -> vector<8x32xf32>
    %357 = arith.truncf %356 : vector<8x32xf32> to vector<8x32xbf16>
    %c0_79 = arith.constant 0 : index
    %c0_80 = arith.constant 0 : index
    %358 = vector.load %arg9[%c0_79, %c0_80] : memref<32x32xbf16, #tpu.memory_space<vmem>>, vector<32x32xbf16>
    %cst_81 = arith.constant dense<0.000000e+00> : vector<8x32xf32>
    %359 = tpu.matmul %357, %358, %cst_81 {dimension_numbers = #tpu.dot_dimension_numbers<[1], [0], [0], [1], [0, 0, 1, 1], [], []>} : vector<8x32xbf16>, vector<32x32xbf16>, vector<8x32xf32> -> vector<8x32xf32>
    %c0_82 = arith.constant 0 : index
    %c0_83 = arith.constant 0 : index
    %360 = vector.load %arg10[%c0_82, %c0_83] : memref<1x32xf32, #tpu.memory_space<vmem>>, vector<1x32xf32>
    %361 = vector.broadcast %360 : vector<1x32xf32> to vector<8x32xf32>
    %362 = arith.addf %359, %361 : vector<8x32xf32>
    %cst_84 = arith.constant 0.000000e+00 : f32
    %363 = vector.broadcast %cst_84 : f32 to vector<8x32xf32>
    %364 = arith.maximumf %362, %363 : vector<8x32xf32>
    %365 = arith.addf %356, %364 : vector<8x32xf32>
    %366 = vector.shape_cast %365 : vector<8x32xf32> to vector<1x8x32xf32>
    %c0_85 = arith.constant 0 : index
    %c0_86 = arith.constant 0 : index
    %c0_87 = arith.constant 0 : index
    %367 = vector.load %arg11[%c0_85, %c0_86, %c0_87] : memref<1x8x32xf32, #tpu.memory_space<vmem>>, vector<1x8x32xf32>
    tpu.vector_store %arg11[%c0_85, %c0_86, %c0_87], %366 {strides = array<i32>} : memref<1x8x32xf32, #tpu.memory_space<vmem>>, vector<1x8x32xf32>,
    return
  }
  func.func @transform_0(%arg0: i32) -> i32 {
    %c0_i32 = arith.constant 0 : i32
    %c0_i32_0 = arith.constant 0 : i32
    return %c0_i32 : i32
  }
  func.func @transform_1(%arg0: i32) -> i32 {
    %c0_i32 = arith.constant 0 : i32
    %c0_i32_0 = arith.constant 0 : i32
    return %c0_i32 : i32
  }
  func.func @transform_2(%arg0: i32) -> i32 {
    %c0_i32 = arith.constant 0 : i32
    %c0_i32_0 = arith.constant 0 : i32
    return %c0_i32 : i32
  }
  func.func @transform_3(%arg0: i32) -> i32 {
    %c0_i32 = arith.constant 0 : i32
    %c0_i32_0 = arith.constant 0 : i32
    return %c0_i32 : i32
  }
  func.func @transform_4(%arg0: i32) -> (i32, i32, i32) {
    %c0_i32 = arith.constant 0 : i32
    %c0_i32_0 = arith.constant 0 : i32
    %c0_i32_1 = arith.constant 0 : i32
    return %arg0, %c0_i32, %c0_i32_0 : i32, i32, i32
  }
  func.func @transform_5(%arg0: i32) -> (i32, i32, i32, i32) {
    %c0_i32 = arith.constant 0 : i32
    %c0_i32_0 = arith.constant 0 : i32
    %c0_i32_1 = arith.constant 0 : i32
    %c0_i32_2 = arith.constant 0 : i32
    return %arg0, %c0_i32, %c0_i32_0, %c0_i32_1 : i32, i32, i32, i32
  }
  func.func @transform_6(%arg0: i32) -> (i32, i32) {
    %c0_i32 = arith.constant 0 : i32
    %c0_i32_0 = arith.constant 0 : i32
    %c0_i32_1 = arith.constant 0 : i32
    return %c0_i32, %c0_i32_0 : i32, i32
  }
  func.func @transform_7(%arg0: i32) -> (i32, i32) {
    %c0_i32 = arith.constant 0 : i32
    %c0_i32_0 = arith.constant 0 : i32
    %c0_i32_1 = arith.constant 0 : i32
    return %c0_i32, %c0_i32_0 : i32, i32
  }
  func.func @transform_8(%arg0: i32) -> (i32, i32) {
    %c0_i32 = arith.constant 0 : i32
    %c0_i32_0 = arith.constant 0 : i32
    %c0_i32_1 = arith.constant 0 : i32
    return %c0_i32, %c0_i32_0 : i32, i32
  }
  func.func @transform_9(%arg0: i32) -> (i32, i32) {
    %c0_i32 = arith.constant 0 : i32
    %c0_i32_0 = arith.constant 0 : i32
    %c0_i32_1 = arith.constant 0 : i32
    return %c0_i32, %c0_i32_0 : i32, i32
  }
  func.func @transform_10(%arg0: i32) -> (i32, i32, i32) {
    %c0_i32 = arith.constant 0 : i32
    %c0_i32_0 = arith.constant 0 : i32
    %c0_i32_1 = arith.constant 0 : i32
    return %arg0, %c0_i32, %c0_i32_0 : i32, i32, i32
  }
}

</mosaic_0001>

<bundles_post_ra>
// kernel: eqv_self_attention.1
= control target key start
LH: loop header
LB: loop body
LE: loop exit
PB: predicated region body
PF: predicated region fallthrough
CT: control target
= control target key end

     0   :  { %s2464_s0 = inlined_call_operand.vmem [shape: f32[36], index: 0, kind: input, shape index: {}]   ;;  %s2465_s1 = inlined_call_operand.vmem [shape: f32[12], index: 1, kind: input, shape index: {}]   ;;  %s2466_s2 = inlined_call_operand.vmem [shape: f32[12], index: 2, kind: input, shape index: {}]   ;;  %s2467_s3 = inlined_call_operand.vmem [shape: f32[4], index: 3, kind: input, shape index: {}]   ;;  %s2468_s4 = inlined_call_operand.vmem [shape: bf16[2,8,32], index: 4, kind: input, shape index: {}]   ;;  %s2469_s5 = inlined_call_operand.vmem [shape: bf16[2,3,8,8], index: 5, kind: input, shape index: {}]   ;;  %s2470_s6 = inlined_call_operand.vmem [shape: bf16[32,96], index: 6, kind: input, shape index: {}]   ;;  %s2471_s7 = inlined_call_operand.vmem [shape: f32[1,96], index: 7, kind: input, shape index: {}]   ;;  %s2472_s8 = inlined_call_operand.vmem [shape: bf16[32,32], index: 8, kind: input, shape index: {}]   ;;  %s2473_s9 = inlined_call_operand.vmem [shape: f32[1,32], index: 9, kind: input, shape index: {}]   ;;  %s2474_s10 = inlined_call_operand.hbm [shape: f32[2,8,32], index: 10, kind: output, shape index: {}]  }
   0x1   :  { %2488 = sst [smem:[#allocation21_spill]] %s2464_s0 }
   0x2   :  { %2489 = sst [smem:[#allocation22_spill]] %s2465_s1 }
   0x3   :  { %2490 = sst [smem:[#allocation23_spill]] %s2466_s2 }
   0x4   :  { %2491 = sst [smem:[#allocation24_spill]] %s2467_s3 }
   0x5   :  { %2492 = sst [smem:[#allocation25_spill]] %s2468_s4 }
   0x6   :  { %2493 = sst [smem:[#allocation26_spill]] %s2469_s5 }
   0x7   :  { %2494 = sst [smem:[#allocation27_spill]] %s2470_s6 }
   0x8   :  { %2495 = sst [smem:[#allocation28_spill]] %s2471_s7 }
   0x9   :  { %2496 = sst [smem:[#allocation29_spill]] %s2474_s10 }
   0xa   :  { %15 = vsyncpa [#allocation4], 0 }
   0xb   :  { %16 = vsyncpa [#allocation6], 0 }
   0xc   :  { %17 = vsyncpa [#allocation9], 0 }
   0xd   :  { %18 = vsyncpa [#allocation3], 0 }
   0xe   :  { %20 = vsyncpa [#allocation3 + $0x1], 0  ;;  %s1935_s13 = smov 0   ;;  %s1937_s14 = smov 0  }
   0xf   :  { %s1939_s15 = smov 0   ;;  %s1941_s16 = smov 0  }
  0x10 LB: > { %2497 = sst [smem:[#allocation15_spill]] %s1848_s13  ;;  %s1956_s17 = sadd.s32 4294967295, %s1860_s16   ;;  %s1860_s16 = sphi %s1941_s16, %s2531_s16   ;;  %s1856_s15 = sphi %s1939_s15, %s2533_s15   ;;  %s1852_s14 = sphi %s1937_s14, %s2535_s14   ;;  %s1848_s13 = sphi %s1935_s13, %s2534_s13  }
  0x11   : > { %2498 = sst [smem:[#allocation16_spill]] %s1856_s15  ;;  %s1427_s18 = sadd.s32 4294967294, %s1860_s16  }
  0x12   : > { %2499 = sst [smem:[#allocation17_spill]] %s1860_s16  ;;  %s1960_s19 = sadd.s32 1, %s1860_s16  }
  0x13   : > { %2500 = sst [smem:[#allocation18_spill]] %s1960_s19  ;;  %s253_s20 = sadd.s32 1, %s1856_s15 }
  0x14   : > { %s250_s21 = ssub.s32 %s1860_s16, %s1960_s19  ;;  %p263_p0 = scmp.ne.s32.totalorder %s1856_s15, %s1852_s14 }
  0x15   : > { %p251_p1 = scmp.eq.s32.totalorder %s250_s21, 0  ;;  %p264_p2 = scmp.eq.s32.totalorder %s1956_s17, 1 }
  0x16   : > { %p269_p3 = scmp.ne.s32.totalorder %s1852_s14, %s1848_s13  ;;  %p270_p4 = scmp.eq.s32.totalorder %s1427_s18, 1 }
  0x17   : > { %s1971_s22 = scalar_select %p251_p1, %s1856_s15, %s253_s20  }
  0x18   : > { %p1973_p5 = por %p264_p2, %p263_p0  ;;  %p1977_p6 = por %p270_p4, %p269_p3 }
  0x19   : > { %2501 = sst [smem:[#allocation19_spill]] %s1971_s22  ;;  %p1428_p7 = scmp.ge.s32.totalorder %s1860_s16, 1 }
  0x1a   : > { %s2502_s23 = scalar_select %p1973_p5, 1, 0 }
  0x1b   : > { %s2503_s24 = scalar_select %p1977_p6, 1, 0 }
  0x1c   : > { %p277_p8 = scmp.lt.s32.totalorder %s1860_s16, 3  ;;  %p2475_p9 = scmp.eq.s32.totalorder %s1956_s17, 0 }
  0x1d   : > { %2504 = sst [smem:[#allocation20_spill]] %s2503_s24 }
  0x1e   : > { %p1984_p10 = pnand %p1428_p7, %p277_p8  ;;  %s2506_s1 = sld [smem:[#allocation22_spill]] }
  0x1f   : > { %s2507_s0 = sld [smem:[#allocation21_spill]] }
  0x20   : > { %s2505_s25 = scalar_select %p1984_p10, 1, 0 }
  0x21   : > { %p1633_p11 = pneg %p1984_p10  ;;  %s2509_s2 = sld [smem:[#allocation23_spill]] }
  0x22   : > { %s2510_s3 = sld [smem:[#allocation24_spill]] }
  0x23   : > { %p1998_p12 = pnand %p2475_p9, %p1633_p11 }
  0x24   : > { %s301_s28 = sshll.u32 %s2506_s1, 4  ;;  %s302_s28 = int_to_ptr.vmem [resolvable:$true] %s301_s28 }
  0x25   : > { %s290_s11 = sshll.u32 %s2507_s0, 4  ;;  %s1728_s29 = scalar_lea.vmem %s302_s28, 16  ;;  %s291_s11 = int_to_ptr.vmem [resolvable:$true] %s290_s11 }
  0x26   : > { %p1729_p13 = scmp.ne.s32.totalorder %s302_s28, %s1728_s29  ;;  %p1730_p0 = pneg %p1998_p12 }
  0x27   : > { %s312_s21 = sshll.u32 %s2509_s2, 4  ;;  %p1736_p3 = scmp.lt.s32.totalorder %s302_s28, %s302_s28  ;;  %s2005_s21 = int_to_ptr.vmem [resolvable:$true] %s312_s21 }
  0x28   : > { %s323_s1 = sshll.u32 %s2510_s3, 4  ;;  %p1731_p1 = pnand %p1730_p0, %p1729_p13  ;;  %s324_s1 = int_to_ptr.vmem [resolvable:$true] %s323_s1 }
  0x29   : > { %p1737_p4 = scmp.lt.s32.totalorder %s1728_s29, %s1728_s29 }
  0x2a   : > { %p1732_p2 = pneg %p1731_p1 }
  0x2b   : > { %p1738_p7 = por %p1737_p4, %p1736_p3 }
  0x2d   : > { %p1739_p8 = pnand %p1738_p7, %p1732_p2 }
  0x2f   : > { %1742 = shalt.err (!%p1739_p8)
}
  0x30   : > { %s1862_s30 = smov [#allocation5]   ;;  %s1743_s18 = scalar_lea.vmem %s291_s11, 16 }
  0x31   : > { %1639 = dma.vmem_to_smem (!%p1998_p12), %s302_s28, 16, %s1862_s30, [#allocation6]  }
  0x32   : > { %p1744_p11 = scmp.ne.s32.totalorder %s291_s11, %s1743_s18  ;;  %p1751_p5 = scmp.lt.s32.totalorder %s291_s11, %s291_s11 }
  0x33   : > { %p1752_p10 = scmp.lt.s32.totalorder %s1743_s18, %s1743_s18 }
  0x34   : > { %p1746_p9 = pnand %p1744_p11, %p1730_p0 }
  0x35   : > { %p1753_p13 = por %p1752_p10, %p1751_p5 }
  0x36   : > { %p1747_p6 = pneg %p1746_p9 }
  0x38   : > { %p1754_p1 = pnand %p1753_p13, %p1747_p6 }
  0x3a   : > { %1757 = shalt.err (!%p1754_p1)
}
  0x3b   : > { %s1863_s20 = smov [#allocation2]   ;;  %s1758_s28 = scalar_lea.vmem %s2005_s21, 16 }
  0x3c   : > { %1636 = dma.vmem_to_smem (!%p1998_p12), %s291_s11, 16, %s1863_s20, [#allocation4]  }
  0x3d   : > { %p1759_p2 = scmp.ne.s32.totalorder %s2005_s21, %s1758_s28  ;;  %p1766_p9 = scmp.lt.s32.totalorder %s2005_s21, %s2005_s21 }
  0x3e   : > { %p1767_p7 = scmp.lt.s32.totalorder %s1758_s28, %s1758_s28 }
  0x3f   : > { %p1761_p3 = pnand %p1759_p2, %p1730_p0 }
  0x40   : > { %p1768_p5 = por %p1767_p7, %p1766_p9 }
  0x41   : > { %p1762_p4 = pneg %p1761_p3 }
  0x43   : > { %p1769_p6 = pnand %p1768_p5, %p1762_p4 }
  0x45   : > { %1772 = shalt.err (!%p1769_p6)
}
  0x46   : > { %s1864_s26 = smov [#allocation7]   ;;  %s1773_s29 = scalar_lea.vmem %s324_s1, 16 }
  0x47   : > { %1642 = dma.vmem_to_smem (!%p1998_p12), %s2005_s21, 16, %s1864_s26, [#allocation6]  }
  0x48   : > { %p1774_p10 = scmp.ne.s32.totalorder %s324_s1, %s1773_s29  ;;  %p1781_p13 = scmp.lt.s32.totalorder %s324_s1, %s324_s1 }
  0x49   : > { %p1782_p1 = scmp.lt.s32.totalorder %s1773_s29, %s1773_s29 }
  0x4a   : > { %p1776_p8 = pnand %p1774_p10, %p1730_p0 }
  0x4b   : > { %p1783_p2 = por %p1782_p1, %p1781_p13 }
  0x4c   : > { %p1777_p11 = pneg %p1776_p8 }
  0x4e   : > { %p1784_p3 = pnand %p1783_p2, %p1777_p11 }
  0x50   : > { %1787 = shalt.err (!%p1784_p3)
}
  0x51   : > { %s1865_s30 = smov [#allocation8]   ;;  %p2511_p4 = scmp.ne.s32.totalorder %s2505_s25, 0 }
  0x52   : > { %1645 = dma.vmem_to_smem (!%p1998_p12), %s324_s1, 16, %s1865_s30, [#allocation9]  }
  0x53   : > { %363 = sbr.rel (%p2511_p4) target bundleno = 1651 (0x673), region = 60  ;;  %p2512_p9 = scmp.eq.s32.totalorder (!%p2511_p4), %s1956_s17, 0 }
  0x58   : > { %1831 = dma.done.wait (%p2512_p9), [#allocation4], 16   ;;  %p2513_p7 = pmov %p2512_p9 }
  0x5a   : > { %1833 = vsyncadd (%p2513_p7), [#allocation4], 4294967280  ;;  %p2514_p0 = pmov %p2513_p7 }
  0x5c   : > { %1835 = dma.done.wait (%p2514_p0), [#allocation6], 32   ;;  %p2515_p5 = pmov %p2514_p0 }
  0x5d   : > { %p2516_p6 = pmov %p2514_p0 }
  0x5e   : > { %1837 = vsyncadd (%p2515_p5), [#allocation6], 4294967264 }
  0x5f   : > { %1839 = dma.done.wait (%p2516_p6), [#allocation9], 16   ;;  %p2517_p12 = pmov %p2514_p0 }
  0x61   : > { %1841 = vsyncadd (%p2517_p12), [#allocation9], 4294967280 }
  0x62   : > { %381 = sfence }
  0x63   : > { %s2518_s6 = sld [smem:[#allocation27_spill]]  ;;  %v1866_v1 = vmov 0.0   ;;  %vm1867_vm0 = vmmov 0   ;;  %p418_p10 = scmp.lt.s32.totalorder %s1956_s17, 1  ;;  %vm452_vm1 = vcmask 261120   ;;  %vm508_vm2 = vcmask 64512  }
  0x64   : > { %1550 = vmatprep.subr.bf16.mxu0 %v1866_v1  ;;  %1558 = vmatprep.subr.bf16.mxu1 %v1866_v1  ;;  %s2519_s4 = sld [smem:[#allocation25_spill]]  ;;  %s1868_s30 = smov 120   ;;  %vm633_vm3 = vcmask 1043456   ;;  %vm1227_vm4 = vcmask 130048   ;;  %vm1229_vm5 = vcmask 195584  }
  0x65   : > { %1554 = vmatprep.mubr.msk.bf16.mxu0 %vm1867_vm0, %v1866_v1  ;;  %1560 = vmatprep.mubr.msk.bf16.mxu1 %vm1867_vm0, %v1866_v1  ;;  %s2070_s18 = scalar_select %p418_p10, %s1956_s17, 1 }
  0x66   : > { %s2520_s7 = sld [smem:[#allocation28_spill]]  ;;  %s1869_s1 = smov 96  }
  0x67   : > { %s1440_s20 = sshll.u32 %s2070_s18, 2  ;;  %s2479_s25 = smov 80  }
  0x68   : > { %s2478_s12 = smov 88   ;;  %s2480_s21 = smov 72  }
  0x69   : > { %v1708_v0 = vld [vmem:[%s2518_s6 + $0x8] sm:$0xff]   ;;  %v1709_v2 = vld [vmem:[%s2518_s6] sm:$0xff]   ;;  %s1874_s28 = smov 104   ;;  %s2120_s26 = sld [smem:[#allocation2]] }
  0x6a   : > { %1551 = vmatpush3.bf16.msra.mxu0 %v1708_v0  ;;  %s421_s27 = scalar_lea.vmem %s2519_s4, %s1440_s20  ;;  %s1873_s20 = smov 112  }
  0x6b   : > { %1552 = vmatprep.subr.bf16.mxu0 %v1866_v1  ;;  %v428_v3 = vld [vmem:[%s421_s27] sm:$0xf]  ;;  %s2122_s27 = sld [smem:[#allocation2 + $0x3]]  ;;  %p2526_p11 = scmp.ne.s32.totalorder %s2502_s23, 0 }
  0x6c   : > { %v1442_v4 = vld [vmem:[%s2520_s7] ss:$0 sm:$0xff]  ;;  %s2124_s11 = sld [smem:[#allocation2 + $0x6]] }
  0x6d   : > { %s2126_s29 = sld [smem:[#allocation2 + $0x1]] }
  0x6e   : > { %1553 = vmatpush3.bf16.msra.mxu0 %v1709_v2  ;;  %s2141_s0 = sld [smem:[#allocation8]] }
  0x6f   : > { %1564 = vmatprep.subr.bf16.mxu0 %v1866_v1  ;;  %s2143_s2 = sld [smem:[#allocation7]]  ;;  %v560_v26 = vstv %s2120_s26 }
  0x70   : > { %s2145_s3 = sld [smem:[#allocation2 + $0xf]] }
  0x71   : > { %1555 = vmatmul.mubr.msk.bf16.vlgmr.msra.gmra.mxu0 %vm452_vm1, %v428_v3  ;;  %s2521_s5 = sld [smem:[#allocation26_spill]]  ;;  %v563_v27 = vstv %s2122_s27 }
  0x72   : > { %1566 = vmatprep.mubr.msk.bf16.mxu0 %vm1867_vm0, %v1866_v1  ;;  %s2150_s22 = sld [smem:[#allocation5 + $0x1]]  ;;  %v567_v35 = vstv %s2124_s11 }
  0x73   : > { %s2152_s15 = sld [smem:[#allocation5 + $0x3]]  ;;  %v579_v33 = vstv %s2126_s29 }
  0x74   : > { %s2154_s19 = sld [smem:[#allocation7 + $0x1]] }
  0x75   : > { %s2158_s24 = sld [smem:[#allocation2 + $0x8]] }
  0x76   : > { %s2160_s13 = sld [smem:[#allocation8 + $0x1]]  ;;  %v744_v44 = vstv %s2145_s3 }
  0x77   : > { %s2166_s4 = sld [smem:[#allocation7 + $0x3]] }
  0x78   : > { %s2170_s6 = sld [smem:[#allocation5 + $0x2]]  ;;  %v590_v61 = vstv %s2150_s22 }
  0x79   : > { %s2180_s16 = sld [smem:[#allocation2 + $0x15]]  ;;  %v748_v60 = vstv %s2152_s15 }
  0x7a   : > { %s2189_s26 = sld [smem:[#allocation5 + $0x6]] }
  0x7b   : > { %s2193_s27 = sld [smem:[#allocation7 + $0x6]]  ;;  %v605_v48 = vstv %s2158_s24 }
  0x7c   : > { %s2208_s11 = sld [smem:[#allocation2 + $0x10]] }
  0x7d   : > { %s2211_s29 = sld [smem:[#allocation2 + $0xb]] }
  0x7e   : > { %s2215_s3 = sld [smem:[#allocation2 + $0xe]]  ;;  %v609_v2 = vstv %s2170_s6 }
  0x7f   : > { %s2221_s24 = sld [smem:[#allocation7 + $0x4]] }
  0x80   : > { %s2238_s10 = sld [smem:[#allocation2 + $0x16]] }
  0x81   : > { %s2242_s15 = sld [smem:[#allocation2 + $0x14]] }
  0x82   : > { %s2246_s22 = sld [smem:[#allocation2 + $0x17]] }
  0x83   : > { %s2261_s6 = sld [smem:[#allocation2 + $0x1e]] }
 0x131   : > { %v490_v5 = vpop.f32.mrf.mxu0 }
 0x132   : > { %v2083_v6 = vadd.f32 %v1442_v4, %v490_v5  ;;  %v916_v4 = vstv %s2180_s16  ;;  %s2257_s16 = sld [smem:[#allocation2 + $0x19]] }
 0x133   : > { %v1556_v7 = vpop.f32.mrf.mxu0 }
 0x134   : > { %v2087_v8 = vpack.c.bf16 %v2083_v6, %v2083_v6 }
 0x135   : > { %v493_v9 = vpop.f32.mrf.mxu0 }
 0x136   : > { %682 = vrot.lane.b32.xlu1 %v2087_v8, %s1868_s30  ;;  %506 = vrot.lane.b32.xlu0 %v2087_v8, %s1869_s1  ;;  %s2128_s30 = sld [smem:[#allocation2 + $0x4]]  ;;  %v775_v9 = vstv %s2211_s29 }
 0x137   : > { %v1557_v10 = vpop.f32.mrf.mxu0  ;;  %s2130_s1 = sld [smem:[#allocation2 + $0x7]] }
 0x138   : > { %v778_v10 = vstv %s2215_s3  ;;  %s2321_s29 = sld [smem:[#allocation8 + $0x2]] }
 0x139   : > { %s2327_s3 = sld [smem:[#allocation7 + $0x7]] }
 0x13a   : > { %860 = vrot.lane.b32.xlu1 %v2087_v8, %s2479_s25  ;;  %684 = vrot.lane.b32.xlu0 %v2087_v8, %s2478_s12  ;;  %s2136_s12 = sld [smem:[#allocation2 + $0x9]]  ;;  %s1614_s25 = smul.u32 12, %s2070_s18 }
 0x13b   : > { %s2156_s18 = sld [smem:[#allocation2 + $0x5]] }
 0x13c   : > { %s426_s7 = scalar_lea.vmem %s2521_s5, %s1614_s25  ;;  %s2172_s25 = sld [smem:[#allocation7 + $0x2]]  ;;  %v582_v34 = vstv %s2128_s30 }
 0x13d   : > { %v1525_v22 = vld [vmem:[%s426_s7] sm:$0xff]   ;;  %v1447_v25 = vld [vmem:[%s426_s7 + $0x8] sm:$0xf]  ;;  %s2174_s5 = sld [smem:[#allocation2 + $0x12]]  ;;  %v586_v45 = vstv %s2130_s1 }
 0x13e   : > { %1036 = vrot.lane.b32.xlu1 %v2087_v8, %s2480_s21  ;;  %858 = vrot.lane.b32.xlu0 %v2087_v8, %s1873_s20  ;;  %s2132_s20 = sld [smem:[#allocation5]]  ;;  %v2162_v23 = vunpack.c.l.bf16 %v1525_v22  ;;  %v2164_v24 = vunpack.c.h.bf16 %v1525_v22  ;;  %v2176_v28 = vunpack.c.l.bf16 %v1447_v25  ;;  %v557_v22 = vstv %s2141_s0 }
 0x13f   : > { %s2139_s21 = sld [smem:[#allocation2 + $0xc]] }
 0x140   : > { %v561_v29 = vmul.f32 %v2162_v23, %v560_v26  ;;  %v564_v30 = vmul.f32 %v2164_v24, %v563_v27  ;;  %v737_v31 = vstv %s2136_s12  ;;  %s2186_s7 = sld [smem:[#allocation2 + $0x18]]  ;;  %v580_v40 = vmul.f32 %v2162_v23, %v579_v33 }
 0x141   : > { %v601_v37 = vstv %s2156_s18  ;;  %v738_v38 = vmul.f32 %v2162_v23, %v737_v31  ;;  %v583_v41 = vmul.f32 %v2164_v24, %v582_v34  ;;  %s2199_s12 = sld [smem:[#allocation2 + $0xa]]  ;;  %v568_v43 = vmul.f32 %v567_v35, %v2176_v28 }
 0x142   : > { %1034 = vrot.lane.b32.xlu0 %v2087_v8, %s1874_s28  ;;  %s2134_s28 = sld [smem:[#allocation2 + $0x2]]  ;;  %v565_v42 = vadd.f32 %v564_v30, %v561_v29  ;;  %v602_v47 = vmul.f32 %v2164_v24, %v601_v37  ;;  %v745_v50 = vmul.f32 %v744_v44, %v2176_v28  ;;  %v587_v52 = vmul.f32 %v586_v45, %v2176_v28 }
 0x143   : > { %v584_v51 = vadd.f32 %v583_v41, %v580_v40  ;;  %s2217_s30 = sld [smem:[#allocation5 + $0x4]]  ;;  %v606_v56 = vmul.f32 %v605_v48, %v2176_v28  ;;  %v913_v3 = vstv %s2174_s5  ;;  %v752_v29 = vstv %s2166_s4 }
 0x144   : > { %v569_v53 = vadd.f32 %v568_v43, %v565_v42  ;;  %v571_v54 = vstv %s2132_s20  ;;  %s2223_s1 = sld [smem:[#allocation2 + $0x11]]  ;;  %v594_v30 = vstv %s2154_s19  ;;  %v935_v40 = vstv %s2238_s10 }
 0x145   : > { %v740_v32 = vstv %s2139_s21  ;;  %s2204_s21 = sld [smem:[#allocation2 + $0xd]]  ;;  %v588_v58 = vadd.f32 %v587_v52, %v584_v51  ;;  %v734_v41 = vstv %s2160_s13  ;;  %v613_v44 = vstv %s2172_s25 }
 0x146   : > { %v741_v39 = vmul.f32 %v2164_v24, %v740_v32  ;;  %v572_v59 = vadd.f32 %v571_v54, %v569_v53  ;;  %s2229_s20 = sld [smem:[#allocation7 + $0x5]]  ;;  %v924_v45 = vstv %s2189_s26  ;;  %v954_v48 = vstv %s2246_s22  ;;  %s1877_s22 = smov 40  }
 0x147   : > { %v756_v63 = vstv %s2199_s12  ;;  %s2233_s18 = sld [smem:[#allocation2 + $0x13]]  ;;  %v591_v7 = vadd.f32 %v590_v61, %v588_v58  ;;  %v936_v52 = vmul.f32 %v2164_v24, %v935_v40  ;;  %v955_v61 = vmul.f32 %v2164_v24, %v954_v48 }
 0x148   : > { %v598_v36 = vstv %s2134_s28  ;;  %v742_v49 = vadd.f32 %v741_v39, %v738_v38  ;;  %s2225_s28 = sld [smem:[#allocation5 + $0x5]] }
 0x149   : > { %v599_v46 = vmul.f32 %v2162_v23, %v598_v36  ;;  %s2251_s5 = sld [smem:[#allocation2 + $0x1b]]  ;;  %v592_v26 = vmax.f32 %v591_v7, 0.0 }
 0x14a   : > { %v746_v57 = vadd.f32 %v745_v50, %v742_v49  ;;  %v782_v27 = vstv %s2223_s1  ;;  %s2269_s0 = sld [smem:[#allocation2 + $0x21]]  ;;  %v767_v50 = vstv %s2217_s30 }
 0x14b   : > { %v603_v55 = vadd.f32 %v602_v47, %v599_v46  ;;  %v759_v0 = vstv %s2204_s21  ;;  %v783_v38 = vmul.f32 %v782_v27, %v2176_v28  ;;  %s2274_s19 = sld [smem:[#allocation2 + $0x1c]]  ;;  %v595_v43 = vmul.f32 %v594_v30, %v592_v26 }
 0x14c   : > { %v749_v5 = vadd.f32 %v748_v60, %v746_v57  ;;  %s2280_s4 = sld [smem:[#allocation2 + $0x1f]]  ;;  %v951_v47 = vstv %s2242_s15  ;;  %s1876_s15 = smov 64  }
 0x14d   : > { %v607_v62 = vadd.f32 %v606_v56, %v603_v55  ;;  %v932_v39 = vstv %s2233_s18  ;;  %s2290_s10 = sld [smem:[#allocation2 + $0x20]]  ;;  %v939_v56 = vstv %s2257_s16  ;;  %v952_v60 = vmul.f32 %v2162_v23, %v951_v47  ;;  %s2522_s16 = smov 72  }
 0x14e   : > { %v750_v25 = vmax.f32 %v749_v5, 0.0  ;;  %v933_v51 = vmul.f32 %v2162_v23, %v932_v39  ;;  %s2294_s25 = sld [smem:[#allocation5 + $0x7]]  ;;  %v786_v58 = vstv %s2225_s28 }
 0x14f   : > { %v1089_v55 = vstv %s2251_s5  ;;  %s2300_s26 = sld [smem:[#allocation2 + $0x22]]  ;;  %s1878_s5 = smov 48  }
 0x150   : > { %v2277_v42 = vmul.f32 %v752_v29, %v750_v25  ;;  %s2304_s12 = sld [smem:[#allocation5 + $0x8]]  ;;  %v1090_v5 = vmul.f32 %v2162_v23, %v1089_v55  ;;  %v937_v7 = vadd.f32 %v936_v52, %v933_v51  ;;  %v790_v25 = vstv %s2229_s20 }
 0x151   : > { %s2310_s21 = sld [smem:[#allocation2 + $0x23]] }
 0x152   : > { %s2332_s30 = sld [smem:[#allocation5 + $0xa]] }
 0x153   : > { %v1130_v30 = vstv %s2290_s10  ;;  %s2342_s1 = sld [smem:[#allocation5 + $0xb]]  ;;  %s415_s10 = sand.u32 1, %s1852_s14  }
 0x154   : > { %s2353_s13 = sld [smem:[#allocation7 + $0x9]] }
 0x155   : > { %v1115_v39 = vstv %s2300_s26  ;;  %s2356_s28 = sld [smem:[#allocation8 + $0x3]] }
 0x156   : > { %s2362_s20 = sld [smem:[#allocation7 + $0xa]] }
 0x157   : > { %s1514_s18 = sld [smem:[#allocation7 + $0xb]] }
 0x1a8   : > { %v507_v11 = vpop.permute.xlu0 %506  ;;  %v683_v14 = vpop.permute.xlu1 %682 }
 0x1a9   : > { %v513_v12 = vsel %vm508_vm2, %v507_v11, 0  ;;  %v573_v11 = vmax.f32 %v572_v59, 0.0  ;;  %v1092_v59 = vstv %s2261_s6  ;;  %s2523_s6 = smov 80  }
 0x1aa   : > { %1559 = vmatpush3.bf16.xpose.msra.mxu1 %v513_v12  ;;  %v757_v12 = vmul.f32 %v2162_v23, %v756_v63  ;;  %v928_v63 = vstv %s2193_s27  ;;  %s1875_s27 = smov 56  }
 0x1ab   : > { %1570 = vmatprep.subr.bf16.mxu1 %v1866_v1 }
 0x1ac   : > { %v685_v13 = vpop.permute.xlu0 %684  ;;  %v861_v16 = vpop.permute.xlu1 %860 }
 0x1ad   : > { %v690_v15 = vsel %vm508_vm2, %v685_v13, 0  ;;  %v866_v17 = vsel %vm508_vm2, %v861_v16, 0  ;;  %v760_v13 = vmul.f32 %v2164_v24, %v759_v0  ;;  %v917_v16 = vmul.f32 %v2164_v24, %v916_v4 }
 0x1af   : > { %v761_v31 = vadd.f32 %v760_v13, %v757_v12  ;;  %v1093_v12 = vmul.f32 %v2164_v24, %v1092_v59  ;;  %v1096_v13 = vstv %s2269_s0 }
 0x1b0   : > { %v1037_v18 = vpop.permute.xlu1 %1036  ;;  %v859_v19 = vpop.permute.xlu0 %858  ;;  %v1097_v26 = vmul.f32 %v1096_v13, %v2176_v28 }
 0x1b1   : > { %1561 = vmatmul.mubr.msk.bf16.vlgmr.msra.gmra.mxu1 %vm508_vm2, %v2087_v8  ;;  %v1042_v20 = vsel %vm508_vm2, %v1037_v18, 0  ;;  %v575_v18 = vstv %s2143_s2  ;;  %s2266_s2 = sld [smem:[#allocation2 + $0x1a]] }
 0x1b2   : > { %1571 = vmatpush3.bf16.xpose.msra.mxu1 %v690_v15  ;;  %1572 = vmatprep.mubr.msk.bf16.mxu1 %vm1867_vm0, %v1866_v1  ;;  %v914_v15 = vmul.f32 %v2162_v23, %v913_v3  ;;  %v576_v33 = vmul.f32 %v575_v18, %v573_v11  ;;  %v1111_v18 = vstv %s2280_s4 }
 0x1b3   : > { %1582 = vmatprep.subr.bf16.mxu1 %v1866_v1 }
 0x1b4   : > { %v1035_v21 = vpop.permute.xlu0 %1034  ;;  %v918_v35 = vadd.f32 %v917_v16, %v914_v15  ;;  %v956_v15 = vadd.f32 %v955_v61, %v952_v60 }
 0x1b9   : > { %1573 = vmatmul.mubr.msk.bf16.vlgmr.msra.gmra.mxu1 %vm508_vm2, %v683_v14  ;;  %v610_v14 = vadd.f32 %v609_v2, %v607_v62  ;;  %v958_v2 = vstv %s2266_s2  ;;  %s2524_s2 = smov 88  }
 0x1ba   : > { %1583 = vmatpush3.bf16.xpose.msra.mxu1 %v866_v17  ;;  %1584 = vmatprep.mubr.msk.bf16.mxu1 %vm1867_vm0, %v1866_v1  ;;  %v763_v17 = vstv %s2208_s11  ;;  %s2314_s11 = sld [smem:[#allocation5 + $0x9]]  ;;  %v959_v16 = vmul.f32 %v958_v2, %v2176_v28 }
 0x1bb   : > { %1594 = vmatprep.subr.bf16.mxu1 %v1866_v1  ;;  %v764_v32 = vmul.f32 %v763_v17, %v2176_v28  ;;  %v611_v34 = vmax.f32 %v610_v14, 0.0  ;;  %v1108_v17 = vstv %s2274_s19 }
 0x1bd   : > { %v765_v46 = vadd.f32 %v764_v32, %v761_v31  ;;  %v614_v53 = vmul.f32 %v613_v44, %v611_v34  ;;  %v943_v32 = vstv %s2294_s25  ;;  %v1109_v34 = vmul.f32 %v2162_v23, %v1108_v17  ;;  %s1439_s25 = sshll.u32 %s415_s10, 3 }
 0x1bf   : > { %v768_v0 = vadd.f32 %v767_v50, %v765_v46  ;;  %v1134_v50 = vstv %s2310_s21  ;;  %s1521_s21 = sshll.u32 %s1956_s17, 7  ;;  %s1879_s17 = smov [#allocation10]  }
 0x1c0   : > { %v1135_v60 = vmul.f32 %v1134_v50, %v2176_v28 }
 0x1c1   : > { %1585 = vmatmul.mubr.msk.bf16.vlgmr.msra.gmra.mxu1 %vm508_vm2, %v859_v19  ;;  %v920_v19 = vstv %s2186_s7  ;;  %s2285_s7 = sld [smem:[#allocation2 + $0x1d]] }
 0x1c2   : > { %1595 = vmatpush3.bf16.xpose.msra.mxu1 %v1042_v20  ;;  %1596 = vmatprep.mubr.msk.bf16.mxu1 %vm1867_vm0, %v1866_v1  ;;  %v776_v20 = vmul.f32 %v2162_v23, %v775_v9  ;;  %v921_v36 = vmul.f32 %v920_v19, %v2176_v28  ;;  %v940_v9 = vmul.f32 %v939_v56, %v2176_v28 }
 0x1c3   : > { %1606 = vmatprep.subr.bf16.mxu1 %v1866_v1 }
 0x1c4   : > { %v922_v49 = vadd.f32 %v921_v36, %v918_v35  ;;  %v941_v27 = vadd.f32 %v940_v9, %v937_v7  ;;  %v1119_v9 = vstv %s2332_s30 }
 0x1c6   : > { %v2306_v4 = vadd.f32 %v924_v45, %v922_v49  ;;  %v1131_v45 = vmul.f32 %v2164_v24, %v1130_v30  ;;  %v944_v48 = vadd.f32 %v943_v32, %v941_v27  ;;  %v962_v49 = vstv %s2304_s12 }
 0x1c7   : > { %v1127_v29 = vstv %s2285_s7  ;;  %v1104_v27 = vstv %s2353_s13  ;;  %v1086_v32 = vstv %s2356_s28  ;;  %s1302_s13 = scalar_lea.sflag [#allocation3], %s415_s10 }
 0x1c8   : > { %v945_v2 = vmax.f32 %v944_v48, 0.0 }
 0x1c9   : > { %1597 = vmatmul.mubr.msk.bf16.vlgmr.msra.gmra.mxu1 %vm508_vm2, %v1035_v21  ;;  %v779_v21 = vmul.f32 %v2164_v24, %v778_v10 }
 0x1ca   : > { %1610 = vmatprep.mubr.msk.bf16.mxu1 %vm1867_vm0, %v1866_v1 }
 0x1cb   : > { %v780_v37 = vadd.f32 %v779_v21, %v776_v20  ;;  %v769_v20 = vmax.f32 %v768_v0, 0.0  ;;  %v771_v21 = vstv %s2221_s24  ;;  %s2336_s24 = sld [smem:[#allocation7 + $0x8]] }
 0x1cd   : > { %v784_v54 = vadd.f32 %v783_v38, %v780_v37  ;;  %v1094_v37 = vadd.f32 %v1093_v12, %v1090_v5  ;;  %v960_v38 = vadd.f32 %v959_v16, %v956_v15  ;;  %v772_v47 = vmul.f32 %v771_v21, %v769_v20 }
 0x1ce   : > { %v1138_v15 = vstv %s2342_s1 }
 0x1cf   : > { %v787_v11 = vadd.f32 %v786_v58, %v784_v54  ;;  %v1116_v54 = vmul.f32 %v1115_v39, %v2176_v28  ;;  %v1098_v56 = vadd.f32 %v1097_v26, %v1094_v37  ;;  %v1142_v39 = vstv %s1514_s18 }
 0x1d1   : > { %v788_v36 = vmax.f32 %v787_v11, 0.0 }
 0x1d3   : > { %v791_v55 = vmul.f32 %v790_v25, %v788_v36 }
 0x271   : > { %v549_v57 = vpop.f32.mrf.mxu1 }
 0x272   : > { %v555_v62 = vmul.f32 0.17677669, %v549_v57  ;;  %v1100_v57 = vstv %s2314_s11  ;;  %s417_s11 = scalar_lea.vmem [#allocation10], %s1439_s25 }
 0x273   : > { %v1562_v3 = vpop.f32.mrf.mxu1  ;;  %v1101_v7 = vadd.f32 %v1100_v57, %v1098_v56 }
 0x274   : > { %v558_v10 = vadd.f32 %v557_v22, %v555_v62  ;;  %v910_v62 = vstv %s2321_s29  ;;  %s1315_s29 = sshll.u32 %s417_s11, 4  ;;  %s1316_s29 = int_to_ptr.vmem [resolvable:$true] %s1315_s29 }
 0x275   : > { %v552_v14 = vpop.f32.mrf.mxu1  ;;  %v1102_v21 = vmax.f32 %v1101_v7, 0.0  ;;  %s1788_s28 = scalar_lea.vmem %s1316_s29, 128 }
 0x276   : > { %v577_v19 = vadd.f32 %v576_v33, %v558_v10  ;;  %v1112_v33 = vmul.f32 %v2164_v24, %v1111_v18  ;;  %v926_v24 = vmax.f32 %v2306_v4, 0.0  ;;  %v966_v14 = vstv %s2336_s24  ;;  %s2525_s24 = sld [smem:[#allocation29_spill]]  ;;  %p1789_p8 = scmp.ne.s32.totalorder %s1316_s29, %s1788_s28 }
 0x277   : > { %v1563_v22 = vpop.f32.mrf.mxu1 }
 0x278   : > { %v596_v31 = vadd.f32 %v595_v43, %v577_v19  ;;  %v1128_v43 = vmul.f32 %v2162_v23, %v1127_v29  ;;  %v929_v5 = vmul.f32 %v928_v63, %v926_v24  ;;  %p1790_p13 = pnand %p1789_p8, %p2526_p11 }
 0x279   : > { %v726_v35 = vpop.f32.mrf.mxu1 }
 0x27a   : > { %v732_v40 = vmul.f32 0.17677669, %v726_v35  ;;  %v2334_v44 = vadd.f32 %v614_v53, %v596_v31  ;;  %v1113_v53 = vadd.f32 %v1112_v33, %v1109_v34  ;;  %v1132_v59 = vadd.f32 %v1131_v45, %v1128_v43  ;;  %p1791_p1 = pneg %p1790_p13 }
 0x27b   : > { %v1574_v46 = vpop.f32.mrf.mxu1  ;;  %v1123_v34 = vstv %s2362_s20  ;;  %v1105_v35 = vmul.f32 %v1104_v27, %v1102_v21  ;;  %s1792_s20 = sshll.u32 %s1879_s17, 4  ;;  %s1793_s20 = int_to_ptr.vmem [resolvable:$false] %s1792_s20 }
 0x27c   : > { %v735_v51 = vadd.f32 %v734_v41, %v732_v40  ;;  %v616_v52 = vsel %vm508_vm2, %v2334_v44, -inf  ;;  %v963_v41 = vadd.f32 %v962_v49, %v960_v38  ;;  %v1117_v3 = vadd.f32 %v1116_v54, %v1113_v53  ;;  %s2428_s1 = scalar_lea.hbm %s2525_s24, %s1521_s21  ;;  %s1794_s18 = scalar_lea.vmem %s1793_s20, 256 }
 0x27d   : > { %617 = vmax.xlane.f32.xlu1 %v616_v52  ;;  %v729_v23 = vpop.f32.mrf.mxu1  ;;  %v1136_v12 = vadd.f32 %v1135_v60, %v1132_v59  ;;  %p1795_p2 = scmp.lt.s32.totalorder %s1316_s29, %s1793_s20  ;;  %p1796_p3 = scmp.lt.s32.totalorder %s1794_s18, %s1788_s28 }
 0x27e   : > { %v754_v58 = vadd.f32 %v2277_v42, %v735_v51  ;;  %v947_v42 = vstv %s2327_s3  ;;  %v964_v11 = vmax.f32 %v963_v41, 0.0  ;;  %v1120_v18 = vadd.f32 %v1119_v9, %v1117_v3 }
 0x27f   : > { %v1575_v61 = vpop.f32.mrf.mxu1  ;;  %v948_v63 = vmul.f32 %v947_v42, %v945_v2  ;;  %v1139_v22 = vadd.f32 %v1138_v15, %v1136_v12  ;;  %p1797_p4 = por %p1796_p3, %p1795_p2 }
 0x280   : > { %v773_v0 = vadd.f32 %v772_v47, %v754_v58  ;;  %v967_v25 = vmul.f32 %v966_v14, %v964_v11  ;;  %v1121_v30 = vmax.f32 %v1120_v18, 0.0 }
 0x281   : > { %v902_v4 = vpop.f32.mrf.mxu1  ;;  %v1140_v37 = vmax.f32 %v1139_v22, 0.0  ;;  %p1798_p9 = pnand %p1797_p4, %p1791_p1 }
 0x282   : > { %v908_v28 = vmul.f32 0.17677669, %v902_v4  ;;  %v792_v10 = vadd.f32 %v791_v55, %v773_v0  ;;  %v1124_v45 = vmul.f32 %v1123_v34, %v1121_v30 }
 0x283   : > { %v1586_v13 = vpop.f32.mrf.mxu1  ;;  %v1143_v48 = vmul.f32 %v1142_v39, %v1140_v37 }
 0x284   : > { %v911_v16 = vadd.f32 %v910_v62, %v908_v28  ;;  %v793_v17 = vsel %vm508_vm2, %v792_v10, -inf }
 0x285   : > { %794 = vmax.xlane.f32.xlu0 %v793_v17  ;;  %v905_v19 = vpop.f32.mrf.mxu1 }
 0x286   : > { %v930_v20 = vadd.f32 %v929_v5, %v911_v16 }
 0x287   : > { %v1587_v26 = vpop.f32.mrf.mxu1 }
 0x288   : > { %v949_v29 = vadd.f32 %v948_v63, %v930_v20 }
 0x289   : > { %v1078_v31 = vpop.f32.mrf.mxu1 }
 0x28a   : > { %v1084_v33 = vmul.f32 0.17677669, %v1078_v31  ;;  %v968_v36 = vadd.f32 %v967_v25, %v949_v29 }
 0x28b   : > { %v1598_v38 = vpop.f32.mrf.mxu1 }
 0x28c   : > { %v1087_v40 = vadd.f32 %v1086_v32, %v1084_v33  ;;  %v969_v43 = vsel %vm508_vm2, %v968_v36, -inf }
 0x28d   : > { %970 = vmax.xlane.f32.xlu0 %v969_v43  ;;  %v1081_v46 = vpop.f32.mrf.mxu1 }
 0x28e   : > { %v1106_v47 = vadd.f32 %v1105_v35, %v1087_v40 }
 0x28f   : > { %v1599_v49 = vpop.f32.mrf.mxu1 }
 0x290   : > { %v1125_v50 = vadd.f32 %v1124_v45, %v1106_v47 }
 0x292   : > { %v1144_v51 = vadd.f32 %v1143_v48, %v1125_v50 }
 0x294   : > { %v1145_v52 = vsel %vm508_vm2, %v1144_v51, -inf }
 0x295   : > { %1146 = vmax.xlane.f32.xlu1 %v1145_v52 }
 0x306   : > { %v618_v53 = vpop.xlane.xlu1 %617 }
 0x307   : > { %v619_v54 = vsub.f32 %v2334_v44, %v618_v53 }
 0x309   : > { %v620_v23 = vmul.f32 1.442695, %v619_v54 }
 0x30b   : > { %1712 = vpow2.f32 %v620_v23  ;;  %v1710_v23 = vld [vmem:[%s2472_s8 + $0x8] sm:$0xff]  }
 0x30c   : > { %1607 = vmatpush3.bf16.msra.mxu1 %v1710_v23 }
 0x30d   : > { %1608 = vmatprep.subr.bf16.mxu1 %v1866_v1 }
 0x30e   : > { %v795_v24 = vpop.xlane.xlu0 %794 }
 0x30f   : > { %v796_v55 = vsub.f32 %v792_v10, %v795_v24  ;;  %v1711_v24 = vld [vmem:[%s2472_s8] sm:$0xff]  }
 0x310   : > { %1609 = vmatpush3.bf16.msra.mxu1 %v1711_v24 }
 0x311   : > { %v797_v56 = vmul.f32 1.442695, %v796_v55 }
 0x313   : > { %1714 = vpow2.f32 %v797_v56 }
 0x316   : > { %v971_v57 = vpop.xlane.xlu0 %970 }
 0x317   : > { %v972_v58 = vsub.f32 %v968_v36, %v971_v57 }
 0x318   : > { %v1713_v41 = vpop.eup %1712 }
 0x319   : > { %v973_v59 = vmul.f32 1.442695, %v972_v58  ;;  %v622_v60 = vsel %vm508_vm2, %v1713_v41, 0.0 }
 0x31a   : > { %623 = vadd.xlane.f32.xlu0 %v622_v60 }
 0x31b   : > { %1716 = vpow2.f32 %v973_v59 }
 0x31e   : > { %v1147_v2 = vpop.xlane.xlu1 %1146 }
 0x31f   : > { %v1148_v3 = vsub.f32 %v1144_v51, %v1147_v2 }
 0x320   : > { %v1715_v61 = vpop.eup %1714 }
 0x321   : > { %v799_v62 = vsel %vm508_vm2, %v1715_v61, 0.0  ;;  %v1149_v4 = vmul.f32 1.442695, %v1148_v3 }
 0x322   : > { %800 = vadd.xlane.f32.xlu1 %v799_v62 }
 0x323   : > { %1718 = vpow2.f32 %v1149_v4 }
 0x328   : > { %v1717_v0 = vpop.eup %1716 }
 0x329   : > { %v975_v44 = vsel %vm508_vm2, %v1717_v0, 0.0 }
 0x32a   : > { %976 = vadd.xlane.f32.xlu0 %v975_v44 }
 0x330   : > { %v1719_v5 = vpop.eup %1718 }
 0x331   : > { %v1151_v7 = vsel %vm508_vm2, %v1719_v5, 0.0 }
 0x333   : > { %805 = vrot.lane.b32.xlu1 %v2087_v8, %s1875_s27 }
 0x340   : > { %628 = vrot.lane.b32.xlu0 %v2087_v8, %s1876_s15 }
 0x344   : > { %1157 = vrot.lane.b32.xlu0 %v2087_v8, %s1877_s22 }
 0x357   : > { %1152 = vadd.xlane.f32.xlu1 %v1151_v7 }
 0x368   : > { %981 = vrot.lane.b32.xlu1 %v2087_v8, %s1878_s5 }
 0x3a3   : > { %v624_v42 = vpop.xlane.xlu0 %623 }
 0x3a4   : > { %1720 = vrcp.f32 %v624_v42 }
 0x3ab   : > { %v801_v9 = vpop.xlane.xlu1 %800 }
 0x3ac   : > { %1722 = vrcp.f32 %v801_v9 }
 0x3af   : > { %v806_v14 = vpop.permute.xlu1 %805 }
 0x3b0   : > { %v811_v17 = vsel %vm633_vm3, %v806_v14, 0 }
 0x3b1   : > { %v1721_v28 = vpop.eup %1720 }
 0x3b2   : > { %v626_v11 = vmul.f32 %v1721_v28, %v1713_v41 }
 0x3b3   : > { %v977_v10 = vpop.xlane.xlu0 %976 }
 0x3b4   : > { %v627_v15 = vpack.c.bf16 %v626_v11, %v626_v11  ;;  %1724 = vrcp.f32 %v977_v10 }
 0x3b7   : > { %v629_v12 = vpop.permute.xlu0 %628 }
 0x3b8   : > { %v635_v13 = vsel %vm633_vm3, %v629_v12, 0 }
 0x3b9   : > { %1565 = vmatpush3.bf16.msra.mxu0 %v635_v13  ;;  %v1723_v16 = vpop.eup %1722 }
 0x3ba   : > { %1576 = vmatprep.subr.bf16.mxu0 %v1866_v1  ;;  %v803_v8 = vmul.f32 %v1723_v16, %v1715_v61 }
 0x3bb   : > { %v1158_v22 = vpop.permute.xlu0 %1157 }
 0x3bc   : > { %1567 = vmatmul.mubr.msk.bf16.vlgmr.msra.gmra.mxu0 %vm508_vm2, %v627_v15  ;;  %v804_v63 = vpack.c.bf16 %v803_v8, %v803_v8  ;;  %v1163_v27 = vsel %vm633_vm3, %v1158_v22, 0 }
 0x3bd   : > { %1577 = vmatpush3.bf16.msra.mxu0 %v811_v17  ;;  %1578 = vmatprep.mubr.msk.bf16.mxu0 %vm1867_vm0, %v1866_v1 }
 0x3be   : > { %1588 = vmatprep.subr.bf16.mxu0 %v1866_v1 }
 0x3c1   : > { %v1725_v18 = vpop.eup %1724 }
 0x3c2   : > { %v979_v20 = vmul.f32 %v1725_v18, %v1717_v0 }
 0x3c4   : > { %1579 = vmatmul.mubr.msk.bf16.vlgmr.msra.gmra.mxu0 %vm508_vm2, %v804_v63  ;;  %v980_v26 = vpack.c.bf16 %v979_v20, %v979_v20 }
 0x3c5   : > { %1590 = vmatprep.mubr.msk.bf16.mxu0 %vm1867_vm0, %v1866_v1 }
 0x3e0   : > { %v1153_v19 = vpop.xlane.xlu1 %1152 }
 0x3e1   : > { %1726 = vrcp.f32 %v1153_v19 }
 0x3e4   : > { %v982_v21 = vpop.permute.xlu1 %981 }
 0x3e5   : > { %v987_v25 = vsel %vm633_vm3, %v982_v21, 0 }
 0x3e6   : > { %1589 = vmatpush3.bf16.msra.mxu0 %v987_v25 }
 0x3e7   : > { %1600 = vmatprep.subr.bf16.mxu0 %v1866_v1 }
 0x3e9   : > { %1591 = vmatmul.mubr.msk.bf16.vlgmr.msra.gmra.mxu0 %vm508_vm2, %v980_v26 }
 0x3ea   : > { %1601 = vmatpush3.bf16.msra.mxu0 %v1163_v27  ;;  %1602 = vmatprep.mubr.msk.bf16.mxu0 %vm1867_vm0, %v1866_v1 }
 0x3ee   : > { %v1727_v29 = vpop.eup %1726 }
 0x3ef   : > { %v1155_v30 = vmul.f32 %v1727_v29, %v1719_v5 }
 0x3f1   : > { %v1156_v31 = vpack.c.bf16 %v1155_v30, %v1155_v30 }
 0x3f3   : > { %1603 = vmatmul.mubr.msk.bf16.vlgmr.msra.gmra.mxu0 %vm508_vm2, %v1156_v31 }
 0x47c   : > { %v671_v32 = vpop.f32.mrf.mxu0 }
 0x47d   : > { %678 = vrot.lane.b32.xlu1 %v671_v32, %s1876_s15 }
 0x47e   : > { %v1568_v34 = vpop.f32.mrf.mxu0 }
 0x480   : > { %v674_v33 = vpop.f32.mrf.mxu0 }
 0x482   : > { %v1569_v35 = vpop.f32.mrf.mxu0 }
 0x484   : > { %v847_v36 = vpop.f32.mrf.mxu0 }
 0x485   : > { %854 = vrot.lane.b32.xlu0 %v847_v36, %s2522_s16 }
 0x486   : > { %v1580_v37 = vpop.f32.mrf.mxu0 }
 0x488   : > { %v850_v38 = vpop.f32.mrf.mxu0 }
 0x48a   : > { %v1581_v39 = vpop.f32.mrf.mxu0 }
 0x4a9   : > { %v1023_v40 = vpop.f32.mrf.mxu0 }
 0x4aa   : > { %1030 = vrot.lane.b32.xlu1 %v1023_v40, %s2523_s6 }
 0x4ab   : > { %v1592_v43 = vpop.f32.mrf.mxu0 }
 0x4ad   : > { %v1026_v45 = vpop.f32.mrf.mxu0 }
 0x4af   : > { %v1593_v46 = vpop.f32.mrf.mxu0 }
 0x4b3   : > { %v1199_v47 = vpop.f32.mrf.mxu0 }
 0x4b4   : > { %1206 = vrot.lane.b32.xlu0 %v1199_v47, %s2524_s2 }
 0x4b5   : > { %v1604_v48 = vpop.f32.mrf.mxu0 }
 0x4b7   : > { %v1202_v49 = vpop.f32.mrf.mxu0 }
 0x4b9   : > { %v1605_v50 = vpop.f32.mrf.mxu0 }
 0x4ef   : > { %v679_v51 = vpop.permute.xlu1 %678 }
 0x4f0   : > { %v681_v52 = vadd.f32 %v679_v51, %v2083_v6 }
 0x4f2   : > { %1211 = vrot.lane.b32.xlu1 %v681_v52, %s1876_s15 }
 0x4f7   : > { %v855_v53 = vpop.permute.xlu0 %854 }
 0x4f8   : > { %v857_v54 = vadd.f32 %v855_v53, %v2083_v6 }
 0x4fa   : > { %1215 = vrot.lane.b32.xlu0 %v857_v54, %s1876_s15 }
 0x51c   : > { %v1031_v55 = vpop.permute.xlu1 %1030 }
 0x51d   : > { %v1033_v56 = vadd.f32 %v1031_v55, %v2083_v6 }
 0x51f   : > { %1219 = vrot.lane.b32.xlu1 %v1033_v56, %s1876_s15 }
 0x526   : > { %v1207_v57 = vpop.permute.xlu0 %1206 }
 0x527   : > { %v1209_v58 = vadd.f32 %v1207_v57, %v2083_v6  ;;  %v1516_v6 = vld [vmem:[%s2473_s9] ss:$0 sm:$0xff] }
 0x529   : > { %1223 = vrot.lane.b32.xlu0 %v1209_v58, %s1876_s15 }
 0x564   : > { %v1212_v41 = vpop.permute.xlu1 %1211 }
 0x56c   : > { %v1216_v59 = vpop.permute.xlu0 %1215 }
 0x56d   : > { %v1226_v60 = vsel %vm508_vm2, %v1212_v41, %v1216_v59 }
 0x591   : > { %v1220_v1 = vpop.permute.xlu1 %1219 }
 0x592   : > { %v1228_v61 = vsel %vm1227_vm4, %v1226_v60, %v1220_v1 }
 0x59b   : > { %v1224_v62 = vpop.permute.xlu0 %1223 }
 0x59c   : > { %v1230_v0 = vsel %vm1229_vm5, %v1228_v61, %v1224_v62 }
 0x59d   : > { %v1231_v44 = vpack.c.bf16 %v1230_v0, %v1230_v0 }
 0x59f   : > { %1611 = vmatmul.mubr.msk.bf16.vlgmr.msra.gmra.mxu1 %vm452_vm1, %v1231_v44 }
 0x65f   : > { %v1292_v2 = vpop.f32.mrf.mxu1 }
 0x660   : > { %v1293_v3 = vadd.f32 %v1516_v6, %v1292_v2 }
 0x661   : > { %v1612_v4 = vpop.f32.mrf.mxu1 }
 0x662   : > { %v1298_v5 = vmax.f32 %v1293_v3, 0.0 }
 0x663   : > { %v1295_v7 = vpop.f32.mrf.mxu1 }
 0x664   : > { %v1299_v42 = vadd.f32 %v1298_v5, %v1230_v0 }
 0x665   : > { %v1613_v9 = vpop.f32.mrf.mxu1 }
 0x666   : > { %1300 = vst.msk [vmem:[%s417_s11] sm:$0xff] %vm452_vm1, %v1299_v42 }
 0x667   : > { %1801 = shalt.err (!%p1798_p9)
}
 0x668   : > { %s1802_s27 = scalar_lea.hbm %s2428_s1, 128  ;;  %s1806_s5 = scalar_lea.hbm %s2525_s24, 256 }
 0x669   : > { %p1803_p7 = scmp.ne.s32.totalorder %s2428_s1, %s1802_s27  ;;  %p1807_p6 = scmp.lt.s32.totalorder %s2428_s1, %s2525_s24 }
 0x66a   : > { %p1808_p12 = scmp.lt.s32.totalorder %s1806_s5, %s1802_s27 }
 0x66b   : > { %p1804_p0 = pnand %p1803_p7, %p2526_p11 }
 0x66c   : > { %p1809_p10 = por %p1808_p12, %p1807_p6 }
 0x66d   : > { %p1805_p5 = pneg %p1804_p0 }
 0x66f   : > { %p1810_p8 = pnand %p1809_p10, %p1805_p5 }
 0x671   : > { %1813 = shalt.err (!%p1810_p8)
}
 0x672   : > { %1631 = dma.vmem_to_hbm [thread:$0]  (%p2526_p11), %s1316_s29, 128, %s2428_s1, %s1302_s13  }
 0x673 PF: > { %s2527_s2 = sld [smem:[#allocation17_spill]] }
 0x674   : > { %s2528_s0 = sld [smem:[#allocation15_spill]] }
 0x675   : > { %s2529_s19 = sld [smem:[#allocation20_spill]] }
 0x679   : > { %p1658_p13 = scmp.ge.s32.totalorder %s2527_s2, 2 }
 0x67a   : > { %s1327_s4 = sand.u32 1, %s2528_s0  }
 0x67b   : > { %p2530_p1 = scmp.ne.s32.totalorder %s2529_s19, 0  ;;  %s1328_s7 = scalar_lea.sflag [#allocation3], %s1327_s4 }
 0x67d   : > { %p1647_p2 = pnand %p1658_p13, %p2530_p1 }
 0x67f   : > { %p1648_p3 = pneg %p1647_p2 }
 0x681   : > { %1843 = dma.done.wait (%p1648_p3), %s1328_s7, 128  }
 0x682   : > { %1845 = vsyncadd (%p1648_p3), %s1328_s7, 4294967168  ;;  %s2531_s16 = sld [smem:[#allocation18_spill]]  ;;  %s2534_s13 = smov %s1852_s14 }
 0x683   : > { %s2532_s10 = sld [smem:[#allocation16_spill]] }
 0x684   : > { %s2533_s15 = sld [smem:[#allocation19_spill]] }
 0x688   : > { %p23_p4 = scmp.ge.s32.totalorder %s2531_s16, 4  }
 0x689   : > { %s2535_s14 = smov %s2532_s10 }
 0x68a   :  { %25 = sbr.rel (!%p23_p4) target bundleno = 16 (0x10), region = 117 }
 0x68f   :  { %1333 = vsyncpa [#allocation3], 1 }
 0x690   :  { %1335 = vsyncpa [#allocation3 + $0x1], 1 }
 0x691   :  { %1336 = vsyncpa [#allocation4], 1 }
 0x692   :  { %1338 = vsyncpa [#allocation4 + $0x1], 1 }
 0x693   :  { %1339 = vsyncpa [#allocation6], 1 }
 0x694   :  { %1340 = vsyncpa [#allocation9], 1 }

</bundles_post_ra>
